<compile_context>
chip_gen: v5e
topology: v5e:2x2
jax: 0.10.0
libtpu: 0.0.40
codegen_flags: <defaults>
</compile_context>

<pallas_src>
import numpy as np
import jax
import jax.numpy as jnp
from jax.experimental import pallas as pl
from jax.experimental.pallas import tpu as pltpu


# ----------------------------------------------------------------------------
# Helpers
# ----------------------------------------------------------------------------
def _leaky(x):
    return jnp.where(x > 0, x, 0.1 * x)


def _round_up(x, m):
    return ((x + m - 1) // m) * m


def _pad128(n):
    return _round_up(n, 128)


# ----------------------------------------------------------------------------
# Fused kernel (unrolled at trace time)
# ----------------------------------------------------------------------------
def _make_fused_kernel(n_trunk, ng):
    def kernel(*refs):
        out_ref = refs[-1]
        args = refs[:-1]
        idx = 0

        def nxt():
            nonlocal idx
            r = args[idx]
            idx += 1
            return r

        # --- trunk: inputlay + hiddenlay (Linear + LeakyReLU(0.1) each) -----
        x = nxt()[...]
        for _ in range(n_trunk):
            w = nxt()[...]
            b = nxt()[...]
            x = _leaky(jnp.dot(x, w, preferred_element_type=jnp.float32) + b)

        # --- stage 1: fused 256->512 head projection + LReLU ----------------
        # 128-wide column blocks: [logalphas | means | logstds | dpred-hid1]
        w1 = nxt()[...]
        b1 = nxt()[...]
        h = _leaky(jnp.dot(x, w1, preferred_element_type=jnp.float32) + b1)

        # --- stage 2: block-structured (512, 256) matmul ---------------------
        # cols [0,128)   = head outputs (logalpha|mu|logsig at lanes [0,3*ng))
        # cols [128,256) = dpred hidden2 (50 wide, pre-LReLU)
        w2 = nxt()[...]
        b2 = nxt()[...]
        z = jnp.dot(h, w2, preferred_element_type=jnp.float32) + b2

        heads = z[:, :128]            # lane-aligned slice
        hd = _leaky(z[:, 128:])       # lane-aligned slice, (B, 128)

        # --- dpred tail: 50 -> 15 -> 2 (padded 128x128 matmuls) --------------
        w3 = nxt()[...]
        b3 = nxt()[...]
        hd = _leaky(jnp.dot(hd, w3, preferred_element_type=jnp.float32) + b3)
        w4 = nxt()[...]
        b4 = nxt()[...]
        # dpred lands directly in lanes [3*ng, 3*ng+2); all other lanes zero.
        dpred_slab = jnp.dot(hd, w4, preferred_element_type=jnp.float32) + b4

        # --- finalize: lane-masked log-softmax / clamp, no concatenates ------
        lane = jax.lax.broadcasted_iota(jnp.int32, heads.shape, 1)
        is_la = lane < ng
        is_ls = (lane >= 2 * ng) & (lane < 3 * ng)

        la_vals = jnp.where(is_la, heads, -jnp.inf)
        m = jnp.max(la_vals, axis=1, keepdims=True)
        e = jnp.where(is_la, jnp.exp(heads - m), 0.0)
        lse = m + jnp.log(jnp.sum(e, axis=1, keepdims=True))

        out = jnp.where(is_la, heads - lse, heads)
        out = jnp.where(is_ls, jnp.clip(out, -5.0, 5.0), out)
        out_ref[...] = out + dpred_slab

    return kernel


# ----------------------------------------------------------------------------
# Parameter construction (mimics torch.nn.Linear default init:
# U(-1/sqrt(fan_in), 1/sqrt(fan_in)) for weight and bias).
# Weights stored pre-transposed as (in_features, out_features).
# ----------------------------------------------------------------------------
def init_linear(key, fan_in, fan_out):
    kw, kb = jax.random.split(key)
    bound = 1.0 / np.sqrt(fan_in)
    w = jax.random.uniform(kw, (fan_in, fan_out), jnp.float32, -bound, bound)
    b = jax.random.uniform(kb, (1, fan_out), jnp.float32, -bound, bound)
    return w, b


def init_params(key, nhidden, num_gauss):
    params = {}
    keys = iter(jax.random.split(key, 64))

    params["inputlay"] = [init_linear(next(keys), 7, 20)]

    dims = np.linspace(20, 200, nhidden)
    params["hiddenlay"] = [
        init_linear(next(keys), int(dims[k]), int(dims[k + 1]))
        for k in range(nhidden - 1)
    ]

    params["dpred"] = [
        init_linear(next(keys), 200, 100),
        init_linear(next(keys), 100, 50),
        init_linear(next(keys), 50, 15),
        init_linear(next(keys), 15, 2),
    ]

    for name in ("logalphas", "means", "logstds"):
        params[name] = [
            init_linear(next(keys), 200, 100),
            init_linear(next(keys), 100, num_gauss),
        ]
    return params


# ----------------------------------------------------------------------------
# Fuse + lane-pad the weights once (outside the kernel).  All padding is with
# exact zeros, so the math is unchanged.
# ----------------------------------------------------------------------------
def prepare_fused_params(params, ng):
    assert 3 * ng + 2 <= 128, "output packing requires 3*num_gauss + 2 <= 128"

    def pad_wb(w, b, pin, pout):
        din, dout = w.shape
        wp = jnp.zeros((pin, pout), jnp.float32).at[:din, :dout].set(w)
        bp = jnp.zeros((1, pout), jnp.float32).at[:, :dout].set(b)
        return wp, bp

    # --- trunk: pad every output width to a multiple of 128 -----------------
    raw_trunk = [params["inputlay"][0]] + list(params["hiddenlay"])
    trunk = []
    pin = raw_trunk[0][0].shape[0]           # 7 (full-dim block is legal as-is)
    for (w, b) in raw_trunk:
        pout = _pad128(w.shape[1])
        trunk.append(pad_wb(w, b, pin, pout))
        pin = pout
    trunk_out = pin                          # 256 for the default config

    la0, la1 = params["logalphas"]
    mu0, mu1 = params["means"]
    ls0, ls1 = params["logstds"]
    dp = params["dpred"]

    # --- stage 1: four fan-out projections, one 128-wide block each ---------
    w1 = jnp.zeros((trunk_out, 512), jnp.float32)
    b1 = jnp.zeros((1, 512), jnp.float32)
    for k, (w, b) in enumerate((la0, mu0, ls0, dp[0])):
        din, dout = w.shape
        assert dout <= 128
        w1 = w1.at[:din, k * 128:k * 128 + dout].set(w)
        b1 = b1.at[:, k * 128:k * 128 + dout].set(b)

    # --- stage 2: block-structured (512, 256), lane-aligned column layout ---
    #   cols [0,128)   : logalpha[0:ng] | mu[ng:2ng] | logsig[2ng:3ng] | 0
    #   cols [128,256) : dpred hidden2 (50 wide) | 0
    w2 = jnp.zeros((512, 256), jnp.float32)
    b2 = jnp.zeros((1, 256), jnp.float32)
    for k, (w, b) in enumerate((la1, mu1, ls1)):
        hin, hout = w.shape                  # (100, ng)
        w2 = w2.at[k * 128:k * 128 + hin, k * hout:(k + 1) * hout].set(w)
        b2 = b2.at[:, k * hout:(k + 1) * hout].set(b)
    dw, db = dp[1]                           # (100, 50)
    hin, hout = dw.shape
    w2 = w2.at[3 * 128:3 * 128 + hin, 128:128 + hout].set(dw)
    b2 = b2.at[:, 128:128 + hout].set(db)

    # --- dpred tail, padded to 128x128; final layer writes into output lanes
    w3, b3 = pad_wb(dp[2][0], dp[2][1], 128, 128)          # 50->15
    dw4, db4 = dp[3]                                        # 15->2
    w4 = jnp.zeros((128, 128), jnp.float32)
    w4 = w4.at[:dw4.shape[0], 3 * ng:3 * ng + dw4.shape[1]].set(dw4)
    b4 = jnp.zeros((1, 128), jnp.float32)
    b4 = b4.at[:, 3 * ng:3 * ng + db4.shape[1]].set(db4)

    return dict(trunk=trunk, w1=w1, b1=b1, w2=w2, b2=b2,
                w3=w3, b3=b3, w4=w4, b4=b4)


# ----------------------------------------------------------------------------
# Forward pass: ONE fused pallas_call
# ----------------------------------------------------------------------------
def forward(fused, inp, ng, *, block_b=1024):
    batch, in_f = inp.shape
    out_w = 128                              # lane-dense output slab

    # Batch tiling: big tiles to amortize grid-step overhead; for medium
    # batches split into >= 2 balanced blocks so both v7x TensorCores get
    # work under dimension_semantics=("parallel",).
    pb8 = _round_up(batch, 8)
    if pb8 > block_b:
        bb = block_b
    elif pb8 >= 256:
        bb = _round_up((pb8 + 1) // 2, 8)
    else:
        bb = pb8
    padded = _round_up(batch, bb)
    if padded != batch:
        inp = jnp.pad(inp, ((0, padded - batch), (0, 0)))
    n_blocks = padded // bb

    weights = []
    for w, b in fused["trunk"]:
        weights += [w, b]
    weights += [fused["w1"], fused["b1"], fused["w2"], fused["b2"],
                fused["w3"], fused["b3"], fused["w4"], fused["b4"]]

    n_trunk = len(fused["trunk"])
    kernel = _make_fused_kernel(n_trunk, ng)

    # Weights: full-array blocks, resident (constant block index) across grid.
    w_specs = [pl.BlockSpec(w.shape, lambda i: (0, 0)) for w in weights]
    in_specs = [pl.BlockSpec((bb, in_f), lambda i: (i, 0))] + w_specs
    out_specs = pl.BlockSpec((bb, out_w), lambda i: (i, 0))

    # Advisory cost estimate so XLA schedules neighbouring ops around the call.
    flops_per_row = 0
    mats = [w for w, _ in fused["trunk"]] + [fused["w1"], fused["w2"],
                                             fused["w3"], fused["w4"]]
    for w in mats:
        flops_per_row += 2 * int(w.shape[0]) * int(w.shape[1])
    bytes_weights = sum(int(np.prod(w.shape)) * 4 for w in weights)
    cost = pl.CostEstimate(
        flops=int(flops_per_row * padded),
        transcendentals=int(padded * (ng + 2)),
        bytes_accessed=int(padded * in_f * 4 + bytes_weights + padded * out_w * 4),
    )

    out = pl.pallas_call(
        kernel,
        out_shape=jax.ShapeDtypeStruct((padded, out_w), jnp.float32),
        grid=(n_blocks,),
        in_specs=in_specs,
        out_specs=out_specs,
        compiler_params=pltpu.CompilerParams(
            dimension_semantics=("parallel",),
            vmem_limit_bytes=64 << 20,       # headroom over v5e's 16 MiB default
        ),
        cost_estimate=cost,
    )(inp, *weights)

    out = out[:batch]
    logalpha = out[:, 0:ng]
    mu = out[:, ng:2 * ng]
    logsig = out[:, 2 * ng:3 * ng]
    dpred = out[:, 3 * ng:3 * ng + 2]
    return logalpha, mu, logsig, dpred


# ----------------------------------------------------------------------------
# Reference (pure JAX) for a sanity check
# ----------------------------------------------------------------------------
def forward_ref(params, inp):
    def lin(x, wb, leaky):
        w, b = wb
        y = x @ w + b
        return jnp.where(y > 0, y, 0.1 * y) if leaky else y

    x = lin(inp, params["inputlay"][0], True)
    for wb in params["hiddenlay"]:
        x = lin(x, wb, True)
    mu = lin(lin(x, params["means"][0], True), params["means"][1], False)
    logsig = lin(lin(x, params["logstds"][0], True), params["logstds"][1], False)
    logalpha = lin(lin(x, params["logalphas"][0], True), params["logalphas"][1], False)
    h = x
    for i, leaky in zip(range(4), (True, True, True, False)):
        h = lin(h, params["dpred"][i], leaky)     # Dropout(0.01) = identity (eval)
    logsig = jnp.clip(logsig, -5.0, 5.0)
    logalpha = logalpha - jax.scipy.special.logsumexp(logalpha, axis=1, keepdims=True)
    return logalpha, mu, logsig, h


# ----------------------------------------------------------------------------
if __name__ == "__main__":
    nhidden = 4        # hidden widths: linspace(20, 200, 4) -> [20, 80, 140, 200]
    num_gauss = 5

    key = jax.random.PRNGKey(0)
    k_param, k_inp = jax.random.split(key)
    params = init_params(k_param, nhidden, num_gauss)
    fused = prepare_fused_params(params, num_gauss)

    # batch=19 exercises batch padding; batch=300 exercises the 2-block
    # (megacore) grid path.
    for batch in (8, 19, 300):
        inp = jax.random.normal(jax.random.fold_in(k_inp, batch), (batch, 7),
                                dtype=jnp.float32)

        logalpha, mu, logsig, dpred = forward(fused, inp, num_gauss)
        jax.block_until_ready((logalpha, mu, logsig, dpred))

        ref = forward_ref(params, inp)
        for got, want in zip((logalpha, mu, logsig, dpred), ref):
            np.testing.assert_allclose(np.asarray(got), np.asarray(want),
                                       rtol=1e-5, atol=1e-5)

        assert logalpha.shape == (batch, num_gauss)
        assert mu.shape == (batch, num_gauss)
        assert logsig.shape == (batch, num_gauss)
        assert dpred.shape == (batch, 2)

    print("KERNEL_OK")
</pallas_src>

<mosaic_0001>
module attributes {stable_mosaic.version = 11 : i64} {
  func.func @kernel(%arg0: i32, %arg1: memref<8x7xf32, #tpu.memory_space<vmem>>, %arg2: memref<7x128xf32, #tpu.memory_space<vmem>>, %arg3: memref<1x128xf32, #tpu.memory_space<vmem>>, %arg4: memref<128x128xf32, #tpu.memory_space<vmem>>, %arg5: memref<1x128xf32, #tpu.memory_space<vmem>>, %arg6: memref<128x256xf32, #tpu.memory_space<vmem>>, %arg7: memref<1x256xf32, #tpu.memory_space<vmem>>, %arg8: memref<256x256xf32, #tpu.memory_space<vmem>>, %arg9: memref<1x256xf32, #tpu.memory_space<vmem>>, %arg10: memref<256x512xf32, #tpu.memory_space<vmem>>, %arg11: memref<1x512xf32, #tpu.memory_space<vmem>>, %arg12: memref<512x256xf32, #tpu.memory_space<vmem>>, %arg13: memref<1x256xf32, #tpu.memory_space<vmem>>, %arg14: memref<128x128xf32, #tpu.memory_space<vmem>>, %arg15: memref<1x128xf32, #tpu.memory_space<vmem>>, %arg16: memref<128x128xf32, #tpu.memory_space<vmem>>, %arg17: memref<1x128xf32, #tpu.memory_space<vmem>>, %arg18: memref<8x128xf32, #tpu.memory_space<vmem>>) attributes {dimension_semantics = [#tpu.dimension_semantics<parallel>], iteration_bounds = array<i64: 1>, scalar_prefetch = 0 : i64, scratch_operands = 0 : i64, tpu.core_type = #tpu.core_type<tc>, window_params = [{transform_indices = @transform_0, window_bounds = array<i64: 8, 7>}, {pipeline_mode = #tpu.pipeline_mode<synchronous>, transform_indices = @transform_1, window_bounds = array<i64: 7, 128>}, {pipeline_mode = #tpu.pipeline_mode<synchronous>, transform_indices = @transform_2, window_bounds = array<i64: 1, 128>}, {pipeline_mode = #tpu.pipeline_mode<synchronous>, transform_indices = @transform_3, window_bounds = array<i64: 128, 128>}, {pipeline_mode = #tpu.pipeline_mode<synchronous>, transform_indices = @transform_4, window_bounds = array<i64: 1, 128>}, {pipeline_mode = #tpu.pipeline_mode<synchronous>, transform_indices = @transform_5, window_bounds = array<i64: 128, 256>}, {pipeline_mode = #tpu.pipeline_mode<synchronous>, transform_indices = @transform_6, window_bounds = array<i64: 1, 256>}, {pipeline_mode = #tpu.pipeline_mode<synchronous>, transform_indices = @transform_7, window_bounds = array<i64: 256, 256>}, {pipeline_mode = #tpu.pipeline_mode<synchronous>, transform_indices = @transform_8, window_bounds = array<i64: 1, 256>}, {pipeline_mode = #tpu.pipeline_mode<synchronous>, transform_indices = @transform_9, window_bounds = array<i64: 256, 512>}, {pipeline_mode = #tpu.pipeline_mode<synchronous>, transform_indices = @transform_10, window_bounds = array<i64: 1, 512>}, {pipeline_mode = #tpu.pipeline_mode<synchronous>, transform_indices = @transform_11, window_bounds = array<i64: 512, 256>}, {pipeline_mode = #tpu.pipeline_mode<synchronous>, transform_indices = @transform_12, window_bounds = array<i64: 1, 256>}, {pipeline_mode = #tpu.pipeline_mode<synchronous>, transform_indices = @transform_13, window_bounds = array<i64: 128, 128>}, {pipeline_mode = #tpu.pipeline_mode<synchronous>, transform_indices = @transform_14, window_bounds = array<i64: 1, 128>}, {pipeline_mode = #tpu.pipeline_mode<synchronous>, transform_indices = @transform_15, window_bounds = array<i64: 128, 128>}, {pipeline_mode = #tpu.pipeline_mode<synchronous>, transform_indices = @transform_16, window_bounds = array<i64: 1, 128>}, {transform_indices = @transform_17, window_bounds = array<i64: 8, 128>}]} {
    %c0 = arith.constant 0 : index
    %c0_0 = arith.constant 0 : index
    %0 = vector.load %arg1[%c0, %c0_0] : memref<8x7xf32, #tpu.memory_space<vmem>>, vector<8x7xf32>
    %c0_1 = arith.constant 0 : index
    %c0_2 = arith.constant 0 : index
    %1 = vector.load %arg2[%c0_1, %c0_2] : memref<7x128xf32, #tpu.memory_space<vmem>>, vector<7x128xf32>
    %c0_3 = arith.constant 0 : index
    %c0_4 = arith.constant 0 : index
    %2 = vector.load %arg3[%c0_3, %c0_4] : memref<1x128xf32, #tpu.memory_space<vmem>>, vector<1x128xf32>
    %cst = arith.constant dense<0.000000e+00> : vector<8x128xf32>
    %3 = tpu.matmul %0, %1, %cst {dimension_numbers = #tpu.dot_dimension_numbers<[1], [0], [0], [1], [0, 0, 1, 1], [], []>} : vector<8x7xf32>, vector<7x128xf32>, vector<8x128xf32> -> vector<8x128xf32>
    %4 = vector.broadcast %2 : vector<1x128xf32> to vector<8x128xf32>
    %5 = arith.addf %3, %4 : vector<8x128xf32>
    %cst_5 = arith.constant 0.000000e+00 : f32
    %6 = vector.broadcast %cst_5 : f32 to vector<8x128xf32>
    %7 = arith.cmpf ogt, %5, %6 : vector<8x128xf32>
    %cst_6 = arith.constant 1.000000e-01 : f32
    %8 = vector.broadcast %cst_6 : f32 to vector<8x128xf32>
    %9 = arith.mulf %8, %5 : vector<8x128xf32>
    %10 = arith.select %7, %5, %9 : vector<8x128xi1>, vector<8x128xf32>
    %c0_7 = arith.constant 0 : index
    %c0_8 = arith.constant 0 : index
    %11 = vector.load %arg4[%c0_7, %c0_8] : memref<128x128xf32, #tpu.memory_space<vmem>>, vector<128x128xf32>
    %c0_9 = arith.constant 0 : index
    %c0_10 = arith.constant 0 : index
    %12 = vector.load %arg5[%c0_9, %c0_10] : memref<1x128xf32, #tpu.memory_space<vmem>>, vector<1x128xf32>
    %cst_11 = arith.constant dense<0.000000e+00> : vector<8x128xf32>
    %13 = tpu.matmul %10, %11, %cst_11 {dimension_numbers = #tpu.dot_dimension_numbers<[1], [0], [0], [1], [0, 0, 1, 1], [], []>} : vector<8x128xf32>, vector<128x128xf32>, vector<8x128xf32> -> vector<8x128xf32>
    %14 = vector.broadcast %12 : vector<1x128xf32> to vector<8x128xf32>
    %15 = arith.addf %13, %14 : vector<8x128xf32>
    %cst_12 = arith.constant 0.000000e+00 : f32
    %16 = vector.broadcast %cst_12 : f32 to vector<8x128xf32>
    %17 = arith.cmpf ogt, %15, %16 : vector<8x128xf32>
    %cst_13 = arith.constant 1.000000e-01 : f32
    %18 = vector.broadcast %cst_13 : f32 to vector<8x128xf32>
    %19 = arith.mulf %18, %15 : vector<8x128xf32>
    %20 = arith.select %17, %15, %19 : vector<8x128xi1>, vector<8x128xf32>
    %c0_14 = arith.constant 0 : index
    %c0_15 = arith.constant 0 : index
    %21 = vector.load %arg6[%c0_14, %c0_15] : memref<128x256xf32, #tpu.memory_space<vmem>>, vector<128x256xf32>
    %c0_16 = arith.constant 0 : index
    %c0_17 = arith.constant 0 : index
    %22 = vector.load %arg7[%c0_16, %c0_17] : memref<1x256xf32, #tpu.memory_space<vmem>>, vector<1x256xf32>
    %cst_18 = arith.constant dense<0.000000e+00> : vector<8x256xf32>
    %23 = tpu.matmul %20, %21, %cst_18 {dimension_numbers = #tpu.dot_dimension_numbers<[1], [0], [0], [1], [0, 0, 1, 1], [], []>} : vector<8x128xf32>, vector<128x256xf32>, vector<8x256xf32> -> vector<8x256xf32>
    %24 = vector.broadcast %22 : vector<1x256xf32> to vector<8x256xf32>
    %25 = arith.addf %23, %24 : vector<8x256xf32>
    %cst_19 = arith.constant 0.000000e+00 : f32
    %26 = vector.broadcast %cst_19 : f32 to vector<8x256xf32>
    %27 = arith.cmpf ogt, %25, %26 : vector<8x256xf32>
    %cst_20 = arith.constant 1.000000e-01 : f32
    %28 = vector.broadcast %cst_20 : f32 to vector<8x256xf32>
    %29 = arith.mulf %28, %25 : vector<8x256xf32>
    %30 = arith.select %27, %25, %29 : vector<8x256xi1>, vector<8x256xf32>
    %c0_21 = arith.constant 0 : index
    %c0_22 = arith.constant 0 : index
    %31 = vector.load %arg8[%c0_21, %c0_22] : memref<256x256xf32, #tpu.memory_space<vmem>>, vector<256x256xf32>
    %c0_23 = arith.constant 0 : index
    %c0_24 = arith.constant 0 : index
    %32 = vector.load %arg9[%c0_23, %c0_24] : memref<1x256xf32, #tpu.memory_space<vmem>>, vector<1x256xf32>
    %cst_25 = arith.constant dense<0.000000e+00> : vector<8x256xf32>
    %33 = tpu.matmul %30, %31, %cst_25 {dimension_numbers = #tpu.dot_dimension_numbers<[1], [0], [0], [1], [0, 0, 1, 1], [], []>} : vector<8x256xf32>, vector<256x256xf32>, vector<8x256xf32> -> vector<8x256xf32>
    %34 = vector.broadcast %32 : vector<1x256xf32> to vector<8x256xf32>
    %35 = arith.addf %33, %34 : vector<8x256xf32>
    %cst_26 = arith.constant 0.000000e+00 : f32
    %36 = vector.broadcast %cst_26 : f32 to vector<8x256xf32>
    %37 = arith.cmpf ogt, %35, %36 : vector<8x256xf32>
    %cst_27 = arith.constant 1.000000e-01 : f32
    %38 = vector.broadcast %cst_27 : f32 to vector<8x256xf32>
    %39 = arith.mulf %38, %35 : vector<8x256xf32>
    %40 = arith.select %37, %35, %39 : vector<8x256xi1>, vector<8x256xf32>
    %c0_28 = arith.constant 0 : index
    %c0_29 = arith.constant 0 : index
    %41 = vector.load %arg10[%c0_28, %c0_29] : memref<256x512xf32, #tpu.memory_space<vmem>>, vector<256x512xf32>
    %c0_30 = arith.constant 0 : index
    %c0_31 = arith.constant 0 : index
    %42 = vector.load %arg11[%c0_30, %c0_31] : memref<1x512xf32, #tpu.memory_space<vmem>>, vector<1x512xf32>
    %cst_32 = arith.constant dense<0.000000e+00> : vector<8x512xf32>
    %43 = tpu.matmul %40, %41, %cst_32 {dimension_numbers = #tpu.dot_dimension_numbers<[1], [0], [0], [1], [0, 0, 1, 1], [], []>} : vector<8x256xf32>, vector<256x512xf32>, vector<8x512xf32> -> vector<8x512xf32>
    %44 = vector.broadcast %42 : vector<1x512xf32> to vector<8x512xf32>
    %45 = arith.addf %43, %44 : vector<8x512xf32>
    %cst_33 = arith.constant 0.000000e+00 : f32
    %46 = vector.broadcast %cst_33 : f32 to vector<8x512xf32>
    %47 = arith.cmpf ogt, %45, %46 : vector<8x512xf32>
    %cst_34 = arith.constant 1.000000e-01 : f32
    %48 = vector.broadcast %cst_34 : f32 to vector<8x512xf32>
    %49 = arith.mulf %48, %45 : vector<8x512xf32>
    %50 = arith.select %47, %45, %49 : vector<8x512xi1>, vector<8x512xf32>
    %c0_35 = arith.constant 0 : index
    %c0_36 = arith.constant 0 : index
    %51 = vector.load %arg12[%c0_35, %c0_36] : memref<512x256xf32, #tpu.memory_space<vmem>>, vector<512x256xf32>
    %c0_37 = arith.constant 0 : index
    %c0_38 = arith.constant 0 : index
    %52 = vector.load %arg13[%c0_37, %c0_38] : memref<1x256xf32, #tpu.memory_space<vmem>>, vector<1x256xf32>
    %cst_39 = arith.constant dense<0.000000e+00> : vector<8x256xf32>
    %53 = tpu.matmul %50, %51, %cst_39 {dimension_numbers = #tpu.dot_dimension_numbers<[1], [0], [0], [1], [0, 0, 1, 1], [], []>} : vector<8x512xf32>, vector<512x256xf32>, vector<8x256xf32> -> vector<8x256xf32>
    %54 = vector.broadcast %52 : vector<1x256xf32> to vector<8x256xf32>
    %55 = arith.addf %53, %54 : vector<8x256xf32>
    %56 = vector.extract_strided_slice %55 {offsets = [0, 0], sizes = [8, 128], strides = [1, 1]} : vector<8x256xf32> to vector<8x128xf32>
    %57 = vector.extract_strided_slice %55 {offsets = [0, 128], sizes = [8, 128], strides = [1, 1]} : vector<8x256xf32> to vector<8x128xf32>
    %cst_40 = arith.constant 0.000000e+00 : f32
    %58 = vector.broadcast %cst_40 : f32 to vector<8x128xf32>
    %59 = arith.cmpf ogt, %57, %58 : vector<8x128xf32>
    %cst_41 = arith.constant 1.000000e-01 : f32
    %60 = vector.broadcast %cst_41 : f32 to vector<8x128xf32>
    %61 = arith.mulf %60, %57 : vector<8x128xf32>
    %62 = arith.select %59, %57, %61 : vector<8x128xi1>, vector<8x128xf32>
    %c0_42 = arith.constant 0 : index
    %c0_43 = arith.constant 0 : index
    %63 = vector.load %arg14[%c0_42, %c0_43] : memref<128x128xf32, #tpu.memory_space<vmem>>, vector<128x128xf32>
    %c0_44 = arith.constant 0 : index
    %c0_45 = arith.constant 0 : index
    %64 = vector.load %arg15[%c0_44, %c0_45] : memref<1x128xf32, #tpu.memory_space<vmem>>, vector<1x128xf32>
    %cst_46 = arith.constant dense<0.000000e+00> : vector<8x128xf32>
    %65 = tpu.matmul %62, %63, %cst_46 {dimension_numbers = #tpu.dot_dimension_numbers<[1], [0], [0], [1], [0, 0, 1, 1], [], []>} : vector<8x128xf32>, vector<128x128xf32>, vector<8x128xf32> -> vector<8x128xf32>
    %66 = vector.broadcast %64 : vector<1x128xf32> to vector<8x128xf32>
    %67 = arith.addf %65, %66 : vector<8x128xf32>
    %cst_47 = arith.constant 0.000000e+00 : f32
    %68 = vector.broadcast %cst_47 : f32 to vector<8x128xf32>
    %69 = arith.cmpf ogt, %67, %68 : vector<8x128xf32>
    %cst_48 = arith.constant 1.000000e-01 : f32
    %70 = vector.broadcast %cst_48 : f32 to vector<8x128xf32>
    %71 = arith.mulf %70, %67 : vector<8x128xf32>
    %72 = arith.select %69, %67, %71 : vector<8x128xi1>, vector<8x128xf32>
    %c0_49 = arith.constant 0 : index
    %c0_50 = arith.constant 0 : index
    %73 = vector.load %arg16[%c0_49, %c0_50] : memref<128x128xf32, #tpu.memory_space<vmem>>, vector<128x128xf32>
    %c0_51 = arith.constant 0 : index
    %c0_52 = arith.constant 0 : index
    %74 = vector.load %arg17[%c0_51, %c0_52] : memref<1x128xf32, #tpu.memory_space<vmem>>, vector<1x128xf32>
    %cst_53 = arith.constant dense<0.000000e+00> : vector<8x128xf32>
    %75 = tpu.matmul %72, %73, %cst_53 {dimension_numbers = #tpu.dot_dimension_numbers<[1], [0], [0], [1], [0, 0, 1, 1], [], []>} : vector<8x128xf32>, vector<128x128xf32>, vector<8x128xf32> -> vector<8x128xf32>
    %76 = vector.broadcast %74 : vector<1x128xf32> to vector<8x128xf32>
    %77 = arith.addf %75, %76 : vector<8x128xf32>
    %78 = tpu.iota {dimensions = array<i32: 1>} : vector<8x128xi32>
    %c5_i32 = arith.constant 5 : i32
    %79 = vector.broadcast %c5_i32 : i32 to vector<8x128xi32>
    %80 = arith.cmpi slt, %78, %79 : vector<8x128xi32>
    %c10_i32 = arith.constant 10 : i32
    %81 = vector.broadcast %c10_i32 : i32 to vector<8x128xi32>
    %82 = arith.cmpi sge, %78, %81 : vector<8x128xi32>
    %c15_i32 = arith.constant 15 : i32
    %83 = vector.broadcast %c15_i32 : i32 to vector<8x128xi32>
    %84 = arith.cmpi slt, %78, %83 : vector<8x128xi32>
    %85 = arith.andi %82, %84 : vector<8x128xi1>
    %cst_54 = arith.constant 0xFF800000 : f32
    %86 = vector.broadcast %cst_54 : f32 to vector<8x128xf32>
    %87 = arith.select %80, %56, %86 : vector<8x128xi1>, vector<8x128xf32>
    %cst_55 = arith.constant dense<0xFF800000> : vector<8xf32>
    %88 = vector.multi_reduction <maximumf>, %87, %cst_55 [1] : vector<8x128xf32> to vector<8xf32>
    %89 = vector.shape_cast %88 : vector<8xf32> to vector<8x1xf32>
    %90 = vector.broadcast %89 : vector<8x1xf32> to vector<8x128xf32>
    %91 = arith.subf %56, %90 : vector<8x128xf32>
    %92 = math.exp %91 : vector<8x128xf32>
    %cst_56 = arith.constant 0.000000e+00 : f32
    %93 = vector.broadcast %cst_56 : f32 to vector<8x128xf32>
    %94 = arith.select %80, %92, %93 : vector<8x128xi1>, vector<8x128xf32>
    %cst_57 = arith.constant dense<0.000000e+00> : vector<8xf32>
    %95 = vector.multi_reduction <add>, %94, %cst_57 [1] : vector<8x128xf32> to vector<8xf32>
    %96 = vector.shape_cast %95 : vector<8xf32> to vector<8x1xf32>
    %97 = math.log %96 : vector<8x1xf32>
    %98 = arith.addf %89, %97 : vector<8x1xf32>
    %99 = vector.broadcast %98 : vector<8x1xf32> to vector<8x128xf32>
    %100 = arith.subf %56, %99 : vector<8x128xf32>
    %101 = arith.select %80, %100, %56 : vector<8x128xi1>, vector<8x128xf32>
    %cst_58 = arith.constant -5.000000e+00 : f32
    %cst_59 = arith.constant 5.000000e+00 : f32
    %102 = vector.broadcast %cst_58 : f32 to vector<8x128xf32>
    %103 = arith.maximumf %102, %101 : vector<8x128xf32>
    %104 = vector.broadcast %cst_59 : f32 to vector<8x128xf32>
    %105 = arith.minimumf %104, %103 : vector<8x128xf32>
    %106 = arith.select %85, %105, %101 : vector<8x128xi1>, vector<8x128xf32>
    %107 = arith.addf %106, %77 : vector<8x128xf32>
    %c0_60 = arith.constant 0 : index
    %c0_61 = arith.constant 0 : index
    %108 = vector.load %arg18[%c0_60, %c0_61] : memref<8x128xf32, #tpu.memory_space<vmem>>, vector<8x128xf32>
    tpu.vector_store %arg18[%c0_60, %c0_61], %107 {strides = array<i32>} : memref<8x128xf32, #tpu.memory_space<vmem>>, vector<8x128xf32>,
    return
  }
  func.func @transform_0(%arg0: i32) -> (i32, i32) {
    %c0_i32 = arith.constant 0 : i32
    %c0_i32_0 = arith.constant 0 : i32
    return %arg0, %c0_i32 : i32, i32
  }
  func.func @transform_1(%arg0: i32) -> (i32, i32) {
    %c0_i32 = arith.constant 0 : i32
    %c0_i32_0 = arith.constant 0 : i32
    %c0_i32_1 = arith.constant 0 : i32
    return %c0_i32, %c0_i32_0 : i32, i32
  }
  func.func @transform_2(%arg0: i32) -> (i32, i32) {
    %c0_i32 = arith.constant 0 : i32
    %c0_i32_0 = arith.constant 0 : i32
    %c0_i32_1 = arith.constant 0 : i32
    return %c0_i32, %c0_i32_0 : i32, i32
  }
  func.func @transform_3(%arg0: i32) -> (i32, i32) {
    %c0_i32 = arith.constant 0 : i32
    %c0_i32_0 = arith.constant 0 : i32
    %c0_i32_1 = arith.constant 0 : i32
    return %c0_i32, %c0_i32_0 : i32, i32
  }
  func.func @transform_4(%arg0: i32) -> (i32, i32) {
    %c0_i32 = arith.constant 0 : i32
    %c0_i32_0 = arith.constant 0 : i32
    %c0_i32_1 = arith.constant 0 : i32
    return %c0_i32, %c0_i32_0 : i32, i32
  }
  func.func @transform_5(%arg0: i32) -> (i32, i32) {
    %c0_i32 = arith.constant 0 : i32
    %c0_i32_0 = arith.constant 0 : i32
    %c0_i32_1 = arith.constant 0 : i32
    return %c0_i32, %c0_i32_0 : i32, i32
  }
  func.func @transform_6(%arg0: i32) -> (i32, i32) {
    %c0_i32 = arith.constant 0 : i32
    %c0_i32_0 = arith.constant 0 : i32
    %c0_i32_1 = arith.constant 0 : i32
    return %c0_i32, %c0_i32_0 : i32, i32
  }
  func.func @transform_7(%arg0: i32) -> (i32, i32) {
    %c0_i32 = arith.constant 0 : i32
    %c0_i32_0 = arith.constant 0 : i32
    %c0_i32_1 = arith.constant 0 : i32
    return %c0_i32, %c0_i32_0 : i32, i32
  }
  func.func @transform_8(%arg0: i32) -> (i32, i32) {
    %c0_i32 = arith.constant 0 : i32
    %c0_i32_0 = arith.constant 0 : i32
    %c0_i32_1 = arith.constant 0 : i32
    return %c0_i32, %c0_i32_0 : i32, i32
  }
  func.func @transform_9(%arg0: i32) -> (i32, i32) {
    %c0_i32 = arith.constant 0 : i32
    %c0_i32_0 = arith.constant 0 : i32
    %c0_i32_1 = arith.constant 0 : i32
    return %c0_i32, %c0_i32_0 : i32, i32
  }
  func.func @transform_10(%arg0: i32) -> (i32, i32) {
    %c0_i32 = arith.constant 0 : i32
    %c0_i32_0 = arith.constant 0 : i32
    %c0_i32_1 = arith.constant 0 : i32
    return %c0_i32, %c0_i32_0 : i32, i32
  }
  func.func @transform_11(%arg0: i32) -> (i32, i32) {
    %c0_i32 = arith.constant 0 : i32
    %c0_i32_0 = arith.constant 0 : i32
    %c0_i32_1 = arith.constant 0 : i32
    return %c0_i32, %c0_i32_0 : i32, i32
  }
  func.func @transform_12(%arg0: i32) -> (i32, i32) {
    %c0_i32 = arith.constant 0 : i32
    %c0_i32_0 = arith.constant 0 : i32
    %c0_i32_1 = arith.constant 0 : i32
    return %c0_i32, %c0_i32_0 : i32, i32
  }
  func.func @transform_13(%arg0: i32) -> (i32, i32) {
    %c0_i32 = arith.constant 0 : i32
    %c0_i32_0 = arith.constant 0 : i32
    %c0_i32_1 = arith.constant 0 : i32
    return %c0_i32, %c0_i32_0 : i32, i32
  }
  func.func @transform_14(%arg0: i32) -> (i32, i32) {
    %c0_i32 = arith.constant 0 : i32
    %c0_i32_0 = arith.constant 0 : i32
    %c0_i32_1 = arith.constant 0 : i32
    return %c0_i32, %c0_i32_0 : i32, i32
  }
  func.func @transform_15(%arg0: i32) -> (i32, i32) {
    %c0_i32 = arith.constant 0 : i32
    %c0_i32_0 = arith.constant 0 : i32
    %c0_i32_1 = arith.constant 0 : i32
    return %c0_i32, %c0_i32_0 : i32, i32
  }
  func.func @transform_16(%arg0: i32) -> (i32, i32) {
    %c0_i32 = arith.constant 0 : i32
    %c0_i32_0 = arith.constant 0 : i32
    %c0_i32_1 = arith.constant 0 : i32
    return %c0_i32, %c0_i32_0 : i32, i32
  }
  func.func @transform_17(%arg0: i32) -> (i32, i32) {
    %c0_i32 = arith.constant 0 : i32
    %c0_i32_0 = arith.constant 0 : i32
    return %arg0, %c0_i32 : i32, i32
  }
}

</mosaic_0001>

<bundles_post_ra>
// kernel: tpu_custom_call.1
= control target key start
LH: loop header
LB: loop body
LE: loop exit
PB: predicated region body
PF: predicated region fallthrough
CT: control target
= control target key end

     0   :  { %s1842_s0 = inlined_call_operand.hbm [shape: f32[8,7], index: 0, kind: input, shape index: {}]   ;;  %s1843_s1 = inlined_call_operand.hbm [shape: f32[7,128], index: 1, kind: input, shape index: {}]   ;;  %s1844_s2 = inlined_call_operand.hbm [shape: f32[1,128], index: 2, kind: input, shape index: {}]   ;;  %s1845_s3 = inlined_call_operand.hbm [shape: f32[128,128], index: 3, kind: input, shape index: {}]   ;;  %s1846_s4 = inlined_call_operand.hbm [shape: f32[1,128], index: 4, kind: input, shape index: {}]   ;;  %s1847_s5 = inlined_call_operand.hbm [shape: f32[128,256], index: 5, kind: input, shape index: {}]   ;;  %s1848_s6 = inlined_call_operand.vmem [shape: f32[1,256], index: 6, kind: input, shape index: {}]   ;;  %s1849_s7 = inlined_call_operand.hbm [shape: f32[256,256], index: 7, kind: input, shape index: {}]   ;;  %s1850_s8 = inlined_call_operand.hbm [shape: f32[1,256], index: 8, kind: input, shape index: {}]   ;;  %s1851_s9 = inlined_call_operand.hbm [shape: f32[256,512], index: 9, kind: input, shape index: {}]   ;;  %s1852_s10 = inlined_call_operand.vmem [shape: f32[1,512], index: 10, kind: input, shape index: {}]   ;;  %s1853_s11 = inlined_call_operand.hbm [shape: f32[512,256], index: 11, kind: input, shape index: {}]   ;;  %s1854_s12 = inlined_call_operand.vmem [shape: f32[1,256], index: 12, kind: input, shape index: {}]   ;;  %s1855_s13 = inlined_call_operand.hbm [shape: f32[128,128], index: 13, kind: input, shape index: {}]   ;;  %s1856_s14 = inlined_call_operand.vmem [shape: f32[1,128], index: 14, kind: input, shape index: {}]   ;;  %s1857_s15 = inlined_call_operand.hbm [shape: f32[128,128], index: 15, kind: input, shape index: {}]   ;;  %s1858_s16 = inlined_call_operand.vmem [shape: f32[1,128], index: 16, kind: input, shape index: {}]   ;;  %s1859_s17 = inlined_call_operand.hbm [shape: f32[8,128], index: 17, kind: output, shape index: {}]  }
   0x1   :  { %1860 = sst [smem:[#allocation31_spill]] %s1842_s0 }
   0x2   :  { %1861 = sst [smem:[#allocation32_spill]] %s1843_s1 }
   0x3   :  { %22 = vsyncpa [#allocation3], 0 }
   0x4   :  { %23 = vsyncpa [#allocation6], 0 }
   0x5   :  { %24 = vsyncpa [#allocation9], 0 }
   0x6   :  { %25 = vsyncpa [#allocation12], 0 }
   0x7   :  { %26 = vsyncpa [#allocation15], 0 }
   0x8   :  { %27 = vsyncpa [#allocation18], 0 }
   0x9   :  { %28 = vsyncpa [#allocation21], 0  ;;  %s1862_s26 = sld [smem:[#allocation32_spill]] }
   0xf   :  { %s46_s27 = sshll.u32 %s1862_s26, 4  ;;  %s47_s27 = int_to_ptr.hbm [resolvable:$true] %s46_s27 }
  0x10   :  { %29 = vsyncpa [#allocation4], 0  ;;  %s1650_s28 = smov [#allocation5]   ;;  %s67_s18 = sshll.u32 %s1845_s3, 4  ;;  %s68_s18 = int_to_ptr.hbm [resolvable:$true] %s67_s18 }
  0x11   :  { %s48_s29 = sshll.u32 %s1650_s28, 4  ;;  %s1651_s19 = smov [#allocation8]   ;;  %s49_s29 = int_to_ptr.vmem [resolvable:$true] %s48_s29 }
  0x12   :  { %51 = dma.hbm_to_vmem [thread:$0]  %s47_s27, 128, %s49_s29, [#allocation6]  }
  0x13   :  { %s69_s1 = sshll.u32 %s1651_s19, 4  ;;  %s1652_s20 = smov 128   ;;  %s70_s1 = int_to_ptr.vmem [resolvable:$true] %s69_s1 }
  0x14   :  { %s1653_s21 = smov 8   ;;  %s91_s24 = sshll.u32 %s1847_s5, 4  ;;  %s92_s24 = int_to_ptr.hbm [resolvable:$true] %s91_s24 }
  0x15   :  { %75 = dma.hbm_to_vmem [thread:$0]  %s68_s18, 2048, %s70_s1, [#allocation9], %s1652_s20, %s1652_s20, %s1653_s21  }
  0x16   :  { %s1654_s25 = smov [#allocation11]   ;;  %s120_s28 = sshll.u32 %s1850_s8, 4  ;;  %s121_s28 = int_to_ptr.hbm [resolvable:$true] %s120_s28 }
  0x17   :  { %s93_s26 = sshll.u32 %s1654_s25, 4  ;;  %s1655_s29 = smov 256   ;;  %s94_s26 = int_to_ptr.vmem [resolvable:$true] %s93_s26 }
  0x18   :  { %s1656_s0 = smov 16   ;;  %s1657_s30 = smov [#allocation14]  }
  0x19   :  { %99 = dma.hbm_to_vmem [thread:$0]  %s92_s24, 4096, %s94_s26, [#allocation12], %s1655_s29, %s1655_s29, %s1656_s0  }
  0x1a   :  { %s122_s18 = sshll.u32 %s1657_s30, 4  ;;  %s145_s5 = sshll.u32 %s1853_s11, 4  ;;  %s123_s18 = int_to_ptr.vmem [resolvable:$true] %s122_s18  ;;  %s146_s5 = int_to_ptr.hbm [resolvable:$true] %s145_s5 }
  0x1b   :  { %125 = dma.hbm_to_vmem [thread:$0]  %s121_s28, 32, %s123_s18, [#allocation15]  }
  0x1c   :  { %s1863_s25 = sld [smem:[#allocation31_spill]]  ;;  %s1658_s3 = smov [#allocation17]  }
  0x1d   :  { %s147_s27 = sshll.u32 %s1658_s3, 4  ;;  %s1659_s24 = smov [#allocation2]   ;;  %s148_s27 = int_to_ptr.vmem [resolvable:$true] %s147_s27 }
  0x1e   :  { %153 = dma.hbm_to_vmem [thread:$0]  %s146_s5, 16384, %s148_s27, [#allocation18], %s1655_s29, %s1655_s29, %s1656_s0  }
  0x1f   :  { %s37_s26 = sshll.u32 %s1659_s24, 4  ;;  %s57_s11 = sshll.u32 %s1844_s2, 4  ;;  %s38_s26 = int_to_ptr.vmem [resolvable:$true] %s37_s26  ;;  %s58_s11 = int_to_ptr.hbm [resolvable:$true] %s57_s11 }
  0x20   :  { %s81_s1 = sshll.u32 %s1846_s4, 4  ;;  %s1660_s22 = smov [#allocation7]   ;;  %s82_s1 = int_to_ptr.hbm [resolvable:$true] %s81_s1 }
  0x21   :  { %s59_s23 = sshll.u32 %s1660_s22, 4  ;;  %s106_s24 = sshll.u32 %s1849_s7, 4  ;;  %s60_s23 = int_to_ptr.vmem [resolvable:$true] %s59_s23  ;;  %s107_s24 = int_to_ptr.hbm [resolvable:$true] %s106_s24 }
  0x22   :  { %s35_s8 = sshll.u32 %s1863_s25, 4  ;;  %s1661_s25 = smov [#allocation10]   ;;  %s36_s8 = int_to_ptr.hbm [resolvable:$true] %s35_s8 }
  0x23   :  { %40 = dma.hbm_to_vmem [thread:$0]  %s36_s8, 128, %s38_s26, [#allocation3]  }
  0x24   :  { %62 = dma.hbm_to_vmem [thread:$0]  %s58_s11, 16, %s60_s23, [#allocation6]  }
  0x25   :  { %s83_s5 = sshll.u32 %s1661_s25, 4  ;;  %s130_s26 = sshll.u32 %s1851_s9, 4  ;;  %s84_s5 = int_to_ptr.vmem [resolvable:$true] %s83_s5  ;;  %s131_s26 = int_to_ptr.hbm [resolvable:$true] %s130_s26 }
  0x26   :  { %86 = dma.hbm_to_vmem [thread:$0]  %s82_s1, 16, %s84_s5, [#allocation9]  }
  0x27   :  { %s1662_s30 = smov [#allocation13]   ;;  %s1663_s19 = smov [#allocation16]  }
  0x28   :  { %s108_s4 = sshll.u32 %s1662_s30, 4  ;;  %s132_s11 = sshll.u32 %s1663_s19, 4  ;;  %s109_s4 = int_to_ptr.vmem [resolvable:$true] %s108_s4  ;;  %s133_s11 = int_to_ptr.vmem [resolvable:$true] %s132_s11 }
  0x29   :  { %114 = dma.hbm_to_vmem [thread:$0]  %s107_s24, 8192, %s109_s4, [#allocation12], %s1655_s29, %s1655_s29, %s1656_s0  }
  0x2a   :  { %s1664_s28 = smov 512   ;;  %s1665_s7 = smov 32  }
  0x2b   :  { %138 = dma.hbm_to_vmem [thread:$0]  %s131_s26, 16384, %s133_s11, [#allocation15], %s1664_s28, %s1664_s28, %s1665_s7  }
  0x2c   :  { %s160_s22 = sshll.u32 %s1855_s13, 4  ;;  %s1666_s9 = smov [#allocation19]   ;;  %s161_s22 = int_to_ptr.hbm [resolvable:$true] %s160_s22 }
  0x2d   :  { %s162_s23 = sshll.u32 %s1666_s9, 4  ;;  %s175_s3 = sshll.u32 %s1857_s15, 4  ;;  %s163_s23 = int_to_ptr.vmem [resolvable:$true] %s162_s23  ;;  %s176_s3 = int_to_ptr.hbm [resolvable:$true] %s175_s3 }
  0x2e   :  { %168 = dma.hbm_to_vmem [thread:$0]  %s161_s22, 2048, %s163_s23, [#allocation18], %s1652_s20, %s1652_s20, %s1653_s21  }
  0x2f   :  { %s1667_s29 = smov [#allocation20]  }
  0x30   :  { %s177_s0 = sshll.u32 %s1667_s29, 4  ;;  %s178_s0 = int_to_ptr.vmem [resolvable:$true] %s177_s0 }
  0x31   :  { %183 = dma.hbm_to_vmem [thread:$0]  %s176_s3, 2048, %s178_s0, [#allocation21], %s1652_s20, %s1652_s20, %s1653_s21  }
  0x32   :  { %1634 = dma.done.wait [#allocation3], 128  }
  0x33   :  { %1635 = vsyncadd [#allocation3], 4294967168 }
  0x34   :  { %1636 = dma.done.wait [#allocation6], 144  }
  0x35   :  { %1637 = vsyncadd [#allocation6], 4294967152 }
  0x36   :  { %1638 = dma.done.wait [#allocation9], 2064  }
  0x37   :  { %1639 = vsyncadd [#allocation9], 4294965232 }
  0x38   :  { %1640 = dma.done.wait [#allocation12], 12288  }
  0x39   :  { %1641 = vsyncadd [#allocation12], 4294955008 }
  0x3a   :  { %1642 = dma.done.wait [#allocation15], 16416  }
  0x3b   :  { %1643 = vsyncadd [#allocation15], 4294950880 }
  0x3c   :  { %1644 = dma.done.wait [#allocation18], 18432  }
  0x3d   :  { %1645 = vsyncadd [#allocation18], 4294948864 }
  0x3e   :  { %1646 = dma.done.wait [#allocation21], 2048  }
  0x3f   :  { %1647 = vsyncadd [#allocation21], 4294965248  ;;  %vm244_vm0 = vcmask 1046528   ;;  %vm240_vm1 = vcmask 56320   ;;  %v235_v0 = vld [vmem:[#allocation5] sm:$0x7f] }
  0x40   :  { %v234_v1 = vld [vmem:[#allocation2] sm:$0xff]  ;;  %v286_v2 = vld [vmem:[#allocation8 + $0x78] sm:$0xff]  ;;  %1292 = vmatpush.msk.msra.mxu0 %vm244_vm0, %v235_v0  ;;  %v283_v5 = vld [vmem:[#allocation8 + $0x60] sm:$0xff]  ;;  %s1668_s2 = smov [#allocation22]   ;;  %s1276_s4 = sshll.u32 %s1859_s17, 4  ;;  %s1277_s4 = int_to_ptr.hbm [resolvable:$true] %s1276_s4 }
  0x41   :  { %291 = vmatpush.msra.mxu1 %v286_v2  ;;  %v285_v3 = vld [vmem:[#allocation8 + $0x70] sm:$0xff]  ;;  %1293 = vmatmul.msk.f32.vlgmr.msra.gmra.mxu0 %vm240_vm1, %v234_v1  ;;  %v284_v4 = vld [vmem:[#allocation8 + $0x68] sm:$0xff]  ;;  %v282_v6 = vld [vmem:[#allocation8 + $0x58] sm:$0xff]  ;;  %s1274_s8 = sshll.u32 %s1668_s2, 4  ;;  %s1275_s8 = int_to_ptr.vmem [resolvable:$true] %s1274_s8 }
  0x42   :  { %v281_v7 = vld [vmem:[#allocation8 + $0x50] sm:$0xff]  ;;  %v280_v8 = vld [vmem:[#allocation8 + $0x48] sm:$0xff]  ;;  %v279_v9 = vld [vmem:[#allocation8 + $0x40] sm:$0xff] }
  0x43   :  { %292 = vmatpush.msra.mxu1 %v285_v3  ;;  %v278_v10 = vld [vmem:[#allocation8 + $0x38] sm:$0xff]  ;;  %v277_v11 = vld [vmem:[#allocation8 + $0x30] sm:$0xff]  ;;  %v276_v12 = vld [vmem:[#allocation8 + $0x28] sm:$0xff] }
  0x44   :  { %v275_v13 = vld [vmem:[#allocation8 + $0x20] sm:$0xff]  ;;  %v274_v14 = vld [vmem:[#allocation8 + $0x18] sm:$0xff]  ;;  %v273_v15 = vld [vmem:[#allocation8 + $0x10] sm:$0xff] }
  0x45   :  { %293 = vmatpush.msra.mxu1 %v284_v4  ;;  %v272_v16 = vld [vmem:[#allocation8 + $0x8] sm:$0xff]  ;;  %v271_v17 = vld [vmem:[#allocation8] sm:$0xff]  ;;  %v344_v18 = vld [vmem:[#allocation11 + $0xf0] sm:$0xff] }
  0x46   :  { %v345_v19 = vld [vmem:[#allocation11 + $0xf8] sm:$0xff]  ;;  %v342_v20 = vld [vmem:[#allocation11 + $0xe0] sm:$0xff]  ;;  %352 = vmatpush.msra.mxu2 %v344_v18  ;;  %v343_v21 = vld [vmem:[#allocation11 + $0xe8] sm:$0xff] }
  0x47   :  { %294 = vmatpush.msra.mxu1 %v283_v5  ;;  %372 = vmatpush.msra.mxu3 %v345_v19  ;;  %v340_v22 = vld [vmem:[#allocation11 + $0xd0] sm:$0xff]  ;;  %v341_v23 = vld [vmem:[#allocation11 + $0xd8] sm:$0xff]  ;;  %v338_v24 = vld [vmem:[#allocation11 + $0xc0] sm:$0xff] }
  0x48   :  { %353 = vmatpush.msra.mxu2 %v342_v20  ;;  %v339_v25 = vld [vmem:[#allocation11 + $0xc8] sm:$0xff]  ;;  %v336_v26 = vld [vmem:[#allocation11 + $0xb0] sm:$0xff]  ;;  %v337_v27 = vld [vmem:[#allocation11 + $0xb8] sm:$0xff] }
  0x49   :  { %295 = vmatpush.msra.mxu1 %v282_v6  ;;  %373 = vmatpush.msra.mxu3 %v343_v21  ;;  %v334_v28 = vld [vmem:[#allocation11 + $0xa0] sm:$0xff]  ;;  %v335_v29 = vld [vmem:[#allocation11 + $0xa8] sm:$0xff]  ;;  %v332_v30 = vld [vmem:[#allocation11 + $0x90] sm:$0xff] }
  0x4a   :  { %354 = vmatpush.msra.mxu2 %v340_v22  ;;  %v333_v31 = vld [vmem:[#allocation11 + $0x98] sm:$0xff]  ;;  %v330_v32 = vld [vmem:[#allocation11 + $0x80] sm:$0xff]  ;;  %v331_v33 = vld [vmem:[#allocation11 + $0x88] sm:$0xff] }
  0x4b   :  { %296 = vmatpush.msra.mxu1 %v281_v7  ;;  %374 = vmatpush.msra.mxu3 %v341_v23  ;;  %v328_v34 = vld [vmem:[#allocation11 + $0x70] sm:$0xff]  ;;  %v329_v35 = vld [vmem:[#allocation11 + $0x78] sm:$0xff]  ;;  %v326_v36 = vld [vmem:[#allocation11 + $0x60] sm:$0xff] }
  0x4c   :  { %355 = vmatpush.msra.mxu2 %v338_v24  ;;  %v327_v37 = vld [vmem:[#allocation11 + $0x68] sm:$0xff]  ;;  %v324_v38 = vld [vmem:[#allocation11 + $0x50] sm:$0xff]  ;;  %v325_v39 = vld [vmem:[#allocation11 + $0x58] sm:$0xff] }
  0x4d   :  { %297 = vmatpush.msra.mxu1 %v280_v8  ;;  %375 = vmatpush.msra.mxu3 %v339_v25  ;;  %v322_v40 = vld [vmem:[#allocation11 + $0x40] sm:$0xff]  ;;  %v323_v41 = vld [vmem:[#allocation11 + $0x48] sm:$0xff]  ;;  %v320_v42 = vld [vmem:[#allocation11 + $0x30] sm:$0xff] }
  0x4e   :  { %356 = vmatpush.msra.mxu2 %v336_v26  ;;  %v321_v43 = vld [vmem:[#allocation11 + $0x38] sm:$0xff]  ;;  %v318_v49 = vld [vmem:[#allocation11 + $0x20] sm:$0xff]  ;;  %v319_v50 = vld [vmem:[#allocation11 + $0x28] sm:$0xff] }
  0x4f   :  { %298 = vmatpush.msra.mxu1 %v279_v9  ;;  %376 = vmatpush.msra.mxu3 %v337_v27  ;;  %v1314_v44 = vld [vmem:[#allocation7] ss:$0 sm:$0xff]  ;;  %v316_v51 = vld [vmem:[#allocation11 + $0x10] sm:$0xff]  ;;  %v314_v53 = vld [vmem:[#allocation11] sm:$0xff] }
  0x50   :  { %357 = vmatpush.msra.mxu2 %v334_v28  ;;  %v317_v52 = vld [vmem:[#allocation11 + $0x18] sm:$0xff]  ;;  %v315_v54 = vld [vmem:[#allocation11 + $0x8] sm:$0xff]  ;;  %v428_v55 = vld [vmem:[#allocation13 + $0xf0] sm:$0xff] }
  0x51   :  { %299 = vmatpush.msra.mxu1 %v278_v10  ;;  %377 = vmatpush.msra.mxu3 %v335_v29  ;;  %v460_v56 = vld [vmem:[#allocation13 + $0x1f0] sm:$0xff]  ;;  %v429_v57 = vld [vmem:[#allocation13 + $0xf8] sm:$0xff]  ;;  %v426_v59 = vld [vmem:[#allocation13 + $0xe0] sm:$0xff] }
  0x52   :  { %358 = vmatpush.msra.mxu2 %v332_v30  ;;  %468 = vmatpush.msrb.mxu0 %v428_v55  ;;  %v461_v58 = vld [vmem:[#allocation13 + $0x1f8] sm:$0xff]  ;;  %v458_v60 = vld [vmem:[#allocation13 + $0x1e0] sm:$0xff]  ;;  %v427_v61 = vld [vmem:[#allocation13 + $0xe8] sm:$0xff] }
  0x53   :  { %300 = vmatpush.msra.mxu1 %v277_v11  ;;  %378 = vmatpush.msra.mxu3 %v333_v31  ;;  %v459_v62 = vld [vmem:[#allocation13 + $0x1e8] sm:$0xff]  ;;  %v424_v63 = vld [vmem:[#allocation13 + $0xd0] sm:$0xff]  ;;  %v425_v1 = vld [vmem:[#allocation13 + $0xd8] sm:$0xff] }
  0x54   :  { %359 = vmatpush.msra.mxu2 %v330_v32  ;;  %469 = vmatpush.msrb.mxu0 %v426_v59  ;;  %v456_v0 = vld [vmem:[#allocation13 + $0x1d0] sm:$0xff]  ;;  %v457_v2 = vld [vmem:[#allocation13 + $0x1d8] sm:$0xff]  ;;  %v422_v3 = vld [vmem:[#allocation13 + $0xc0] sm:$0xff] }
  0x55   :  { %301 = vmatpush.msra.mxu1 %v276_v12  ;;  %379 = vmatpush.msra.mxu3 %v331_v33  ;;  %v454_v4 = vld [vmem:[#allocation13 + $0x1c0] sm:$0xff]  ;;  %v423_v5 = vld [vmem:[#allocation13 + $0xc8] sm:$0xff]  ;;  %v420_v7 = vld [vmem:[#allocation13 + $0xb0] sm:$0xff] }
  0x56   :  { %360 = vmatpush.msra.mxu2 %v328_v34  ;;  %470 = vmatpush.msrb.mxu0 %v424_v63  ;;  %v455_v6 = vld [vmem:[#allocation13 + $0x1c8] sm:$0xff]  ;;  %v452_v8 = vld [vmem:[#allocation13 + $0x1b0] sm:$0xff]  ;;  %v421_v9 = vld [vmem:[#allocation13 + $0xb8] sm:$0xff] }
  0x57   :  { %302 = vmatpush.msra.mxu1 %v275_v13  ;;  %380 = vmatpush.msra.mxu3 %v329_v35  ;;  %v453_v10 = vld [vmem:[#allocation13 + $0x1b8] sm:$0xff]  ;;  %v418_v11 = vld [vmem:[#allocation13 + $0xa0] sm:$0xff]  ;;  %v419_v13 = vld [vmem:[#allocation13 + $0xa8] sm:$0xff] }
  0x58   :  { %361 = vmatpush.msra.mxu2 %v326_v36  ;;  %471 = vmatpush.msrb.mxu0 %v422_v3  ;;  %v450_v12 = vld [vmem:[#allocation13 + $0x1a0] sm:$0xff]  ;;  %v449_v18 = vld [vmem:[#allocation13 + $0x198] sm:$0xff]  ;;  %v415_v21 = vld [vmem:[#allocation13 + $0x88] sm:$0xff] }
  0x59   :  { %303 = vmatpush.msra.mxu1 %v274_v14  ;;  %381 = vmatpush.msra.mxu3 %v327_v37  ;;  %v451_v14 = vld [vmem:[#allocation13 + $0x1a8] sm:$0xff]  ;;  %v414_v19 = vld [vmem:[#allocation13 + $0x80] sm:$0xff]  ;;  %v412_v23 = vld [vmem:[#allocation13 + $0x70] sm:$0xff] }
  0x5a   :  { %362 = vmatpush.msra.mxu2 %v324_v38  ;;  %472 = vmatpush.msrb.mxu0 %v420_v7  ;;  %v446_v20 = vld [vmem:[#allocation13 + $0x180] sm:$0xff]  ;;  %v447_v22 = vld [vmem:[#allocation13 + $0x188] sm:$0xff]  ;;  %v444_v24 = vld [vmem:[#allocation13 + $0x170] sm:$0xff] }
  0x5b   :  { %304 = vmatpush.msra.mxu1 %v273_v15  ;;  %382 = vmatpush.msra.mxu3 %v325_v39  ;;  %v416_v15 = vld [vmem:[#allocation13 + $0x90] sm:$0xff]  ;;  %v413_v25 = vld [vmem:[#allocation13 + $0x78] sm:$0xff]  ;;  %v410_v27 = vld [vmem:[#allocation13 + $0x60] sm:$0xff] }
  0x5c   :  { %363 = vmatpush.msra.mxu2 %v322_v40  ;;  %473 = vmatpush.msrb.mxu0 %v418_v11  ;;  %v445_v26 = vld [vmem:[#allocation13 + $0x178] sm:$0xff]  ;;  %v442_v28 = vld [vmem:[#allocation13 + $0x160] sm:$0xff]  ;;  %v411_v29 = vld [vmem:[#allocation13 + $0x68] sm:$0xff] }
  0x5d   :  { %305 = vmatpush.msra.mxu1 %v272_v16  ;;  %383 = vmatpush.msra.mxu3 %v323_v41  ;;  %v448_v16 = vld [vmem:[#allocation13 + $0x190] sm:$0xff]  ;;  %v443_v30 = vld [vmem:[#allocation13 + $0x168] sm:$0xff]  ;;  %v409_v33 = vld [vmem:[#allocation13 + $0x58] sm:$0xff] }
  0x5e   :  { %364 = vmatpush.msra.mxu2 %v320_v42  ;;  %474 = vmatpush.msrb.mxu0 %v416_v15  ;;  %v408_v31 = vld [vmem:[#allocation13 + $0x50] sm:$0xff]  ;;  %v441_v34 = vld [vmem:[#allocation13 + $0x158] sm:$0xff]  ;;  %v406_v35 = vld [vmem:[#allocation13 + $0x40] sm:$0xff] }
  0x5f   :  { %306 = vmatpush.msra.mxu1 %v271_v17  ;;  %384 = vmatpush.msra.mxu3 %v321_v43  ;;  %v417_v17 = vld [vmem:[#allocation13 + $0x98] sm:$0xff]  ;;  %v440_v32 = vld [vmem:[#allocation13 + $0x150] sm:$0xff]  ;;  %v438_v36 = vld [vmem:[#allocation13 + $0x140] sm:$0xff] }
  0x60   :  { %365 = vmatpush.msra.mxu2 %v318_v49  ;;  %475 = vmatpush.msrb.mxu0 %v414_v19  ;;  %v407_v37 = vld [vmem:[#allocation13 + $0x48] sm:$0xff]  ;;  %v404_v39 = vld [vmem:[#allocation13 + $0x30] sm:$0xff]  ;;  %v1315_v41 = vld [vmem:[#allocation10] ss:$0 sm:$0xff] }
  0x61   :  { %385 = vmatpush.msra.mxu3 %v319_v50  ;;  %488 = vmatpush.msrb.mxu1 %v460_v56  ;;  %v439_v38 = vld [vmem:[#allocation13 + $0x148] sm:$0xff]  ;;  %v436_v40 = vld [vmem:[#allocation13 + $0x130] sm:$0xff]  ;;  %v405_v42 = vld [vmem:[#allocation13 + $0x38] sm:$0xff] }
  0x62   :  { %366 = vmatpush.msra.mxu2 %v316_v51  ;;  %476 = vmatpush.msrb.mxu0 %v412_v23  ;;  %v437_v43 = vld [vmem:[#allocation13 + $0x138] sm:$0xff]  ;;  %v434_v49 = vld [vmem:[#allocation13 + $0x120] sm:$0xff]  ;;  %v403_v50 = vld [vmem:[#allocation13 + $0x28] sm:$0xff] }
  0x63   :  { %386 = vmatpush.msra.mxu3 %v317_v52  ;;  %489 = vmatpush.msrb.mxu1 %v458_v60  ;;  %v435_v51 = vld [vmem:[#allocation13 + $0x128] sm:$0xff]  ;;  %v400_v52 = vld [vmem:[#allocation13 + $0x10] sm:$0xff]  ;;  %v433_v55 = vld [vmem:[#allocation13 + $0x118] sm:$0xff] }
  0x64   :  { %367 = vmatpush.msra.mxu2 %v314_v53  ;;  %477 = vmatpush.msrb.mxu0 %v410_v27  ;;  %v432_v53 = vld [vmem:[#allocation13 + $0x110] sm:$0xff]  ;;  %v398_v56 = vld [vmem:[#allocation13] sm:$0xff]  ;;  %v431_v59 = vld [vmem:[#allocation13 + $0x108] sm:$0xff] }
  0x65   :  { %387 = vmatpush.msra.mxu3 %v315_v54  ;;  %490 = vmatpush.msrb.mxu1 %v456_v0  ;;  %v401_v54 = vld [vmem:[#allocation13 + $0x18] sm:$0xff]  ;;  %v614_v60 = vld [vmem:[#allocation16 + $0x1e0] sm:$0xff]  ;;  %v611_v63 = vld [vmem:[#allocation16 + $0x1c8] sm:$0xff] }
  0x66   :  { %508 = vmatpush.msrb.mxu2 %v429_v57  ;;  %478 = vmatpush.msrb.mxu0 %v408_v31  ;;  %v430_v57 = vld [vmem:[#allocation13 + $0x100] sm:$0xff]  ;;  %v679_v3 = vld [vmem:[#allocation16 + $0x3e8] sm:$0xff] }
  0x67   :  { %528 = vmatpush.msrb.mxu3 %v461_v58  ;;  %491 = vmatpush.msrb.mxu1 %v454_v4  ;;  %v399_v58 = vld [vmem:[#allocation13 + $0x8] sm:$0xff] }
  0x68   :  { %509 = vmatpush.msrb.mxu2 %v427_v61  ;;  %479 = vmatpush.msrb.mxu0 %v406_v35  ;;  %v615_v61 = vld [vmem:[#allocation16 + $0x1e8] sm:$0xff]  ;;  %v606_v0 = vld [vmem:[#allocation16 + $0x1a0] sm:$0xff] }
  0x69   :  { %529 = vmatpush.msrb.mxu3 %v459_v62  ;;  %492 = vmatpush.msrb.mxu1 %v452_v8  ;;  %v610_v62 = vld [vmem:[#allocation16 + $0x1c0] sm:$0xff]  ;;  %v675_v7 = vld [vmem:[#allocation16 + $0x3c8] sm:$0xff] }
  0x6a   :  { %510 = vmatpush.msrb.mxu2 %v425_v1  ;;  %480 = vmatpush.msrb.mxu0 %v404_v39  ;;  %v607_v1 = vld [vmem:[#allocation16 + $0x1a8] sm:$0xff]  ;;  %v674_v4 = vld [vmem:[#allocation16 + $0x3c0] sm:$0xff] }
  0x6b   :  { %530 = vmatpush.msrb.mxu3 %v457_v2  ;;  %493 = vmatpush.msrb.mxu1 %v450_v12  ;;  %v678_v2 = vld [vmem:[#allocation16 + $0x3e0] sm:$0xff]  ;;  %v599_v11 = vld [vmem:[#allocation16 + $0x168] sm:$0xff] }
  0x6c   :  { %511 = vmatpush.msrb.mxu2 %v423_v5  ;;  %v602_v5 = vld [vmem:[#allocation16 + $0x180] sm:$0xff]  ;;  %v595_v15 = vld [vmem:[#allocation16 + $0x148] sm:$0xff] }
  0x6d   :  { %531 = vmatpush.msrb.mxu3 %v455_v6  ;;  %494 = vmatpush.msrb.mxu1 %v448_v16  ;;  %v603_v6 = vld [vmem:[#allocation16 + $0x188] sm:$0xff]  ;;  %v670_v8 = vld [vmem:[#allocation16 + $0x3a0] sm:$0xff] }
  0x6e   :  { %512 = vmatpush.msrb.mxu2 %v421_v9  ;;  %v671_v9 = vld [vmem:[#allocation16 + $0x3a8] sm:$0xff]  ;;  %v666_v12 = vld [vmem:[#allocation16 + $0x380] sm:$0xff] }
  0x6f   :  { %532 = vmatpush.msrb.mxu3 %v453_v10  ;;  %495 = vmatpush.msrb.mxu1 %v446_v20  ;;  %v598_v10 = vld [vmem:[#allocation16 + $0x160] sm:$0xff]  ;;  %v591_v19 = vld [vmem:[#allocation16 + $0x128] sm:$0xff] }
  0x70   :  { %513 = vmatpush.msrb.mxu2 %v419_v13  ;;  %v667_v13 = vld [vmem:[#allocation16 + $0x388] sm:$0xff]  ;;  %v662_v16 = vld [vmem:[#allocation16 + $0x360] sm:$0xff] }
  0x71   :  { %533 = vmatpush.msrb.mxu3 %v451_v14  ;;  %496 = vmatpush.msrb.mxu1 %v444_v24  ;;  %v594_v14 = vld [vmem:[#allocation16 + $0x140] sm:$0xff]  ;;  %v587_v23 = vld [vmem:[#allocation16 + $0x108] sm:$0xff] }
  0x72   :  { %514 = vmatpush.msrb.mxu2 %v417_v17  ;;  %v663_v17 = vld [vmem:[#allocation16 + $0x368] sm:$0xff]  ;;  %v658_v20 = vld [vmem:[#allocation16 + $0x340] sm:$0xff] }
  0x73   :  { %534 = vmatpush.msrb.mxu3 %v449_v18  ;;  %497 = vmatpush.msrb.mxu1 %v442_v28  ;;  %v590_v18 = vld [vmem:[#allocation16 + $0x120] sm:$0xff]  ;;  %v583_v27 = vld [vmem:[#allocation16 + $0xe8] sm:$0xff] }
  0x74   :  { %515 = vmatpush.msrb.mxu2 %v415_v21  ;;  %v659_v21 = vld [vmem:[#allocation16 + $0x348] sm:$0xff]  ;;  %v654_v24 = vld [vmem:[#allocation16 + $0x320] sm:$0xff] }
  0x75   :  { %535 = vmatpush.msrb.mxu3 %v447_v22  ;;  %498 = vmatpush.msrb.mxu1 %v440_v32  ;;  %v586_v22 = vld [vmem:[#allocation16 + $0x100] sm:$0xff]  ;;  %v579_v31 = vld [vmem:[#allocation16 + $0xc8] sm:$0xff] }
  0x76   :  { %516 = vmatpush.msrb.mxu2 %v413_v25  ;;  %v655_v25 = vld [vmem:[#allocation16 + $0x328] sm:$0xff]  ;;  %v650_v28 = vld [vmem:[#allocation16 + $0x300] sm:$0xff] }
  0x77   :  { %536 = vmatpush.msrb.mxu3 %v445_v26  ;;  %499 = vmatpush.msrb.mxu1 %v438_v36  ;;  %v582_v26 = vld [vmem:[#allocation16 + $0xe0] sm:$0xff]  ;;  %v575_v35 = vld [vmem:[#allocation16 + $0xa8] sm:$0xff] }
  0x78   :  { %517 = vmatpush.msrb.mxu2 %v411_v29  ;;  %v651_v29 = vld [vmem:[#allocation16 + $0x308] sm:$0xff]  ;;  %v646_v32 = vld [vmem:[#allocation16 + $0x2e0] sm:$0xff] }
  0x79   :  { %537 = vmatpush.msrb.mxu3 %v443_v30  ;;  %500 = vmatpush.msrb.mxu1 %v436_v40  ;;  %v578_v30 = vld [vmem:[#allocation16 + $0xc0] sm:$0xff]  ;;  %v346_v36 = vld [vmem:[%s1848_s6] sm:$0x3] }
  0x7a   :  { %518 = vmatpush.msrb.mxu2 %v409_v33  ;;  %v647_v33 = vld [vmem:[#allocation16 + $0x2e8] sm:$0xff]  ;;  %v570_v39 = vld [vmem:[#allocation16 + $0x80] sm:$0xff] }
  0x7b   :  { %538 = vmatpush.msrb.mxu3 %v441_v34  ;;  %501 = vmatpush.msrb.mxu1 %v434_v49  ;;  %v574_v34 = vld [vmem:[#allocation16 + $0xa0] sm:$0xff]  ;;  %v571_v40 = vld [vmem:[#allocation16 + $0x88] sm:$0xff] }
  0x7c   :  { %519 = vmatpush.msrb.mxu2 %v407_v37  ;;  %v642_v37 = vld [vmem:[#allocation16 + $0x2c0] sm:$0xff] }
  0x7d   :  { %539 = vmatpush.msrb.mxu3 %v439_v38  ;;  %502 = vmatpush.msrb.mxu1 %v432_v53  ;;  %v643_v38 = vld [vmem:[#allocation16 + $0x2c8] sm:$0xff]  ;;  %v562_v49 = vld [vmem:[#allocation16 + $0x40] sm:$0xff] }
  0x7e   :  { %520 = vmatpush.msrb.mxu2 %v405_v42  ;;  %v639_v42 = vld [vmem:[#allocation16 + $0x2a8] sm:$0xff]  ;;  %v630_v53 = vld [vmem:[#allocation16 + $0x260] sm:$0xff] }
  0x7f   :  { %540 = vmatpush.msrb.mxu3 %v437_v43  ;;  %503 = vmatpush.msrb.mxu1 %v430_v57  ;;  %v348_v43 = vperm.slane %v346_v36, 0  ;;  %v558_v57 = vld [vmem:[#allocation16 + $0x20] sm:$0xff] }
  0x80   :  { %521 = vmatpush.msrb.mxu2 %v403_v50  ;;  %v563_v50 = vld [vmem:[#allocation16 + $0x48] sm:$0xff] }
  0x81   :  { %541 = vmatpush.msrb.mxu3 %v435_v51 }
  0x82   :  { %522 = vmatpush.msrb.mxu2 %v401_v54  ;;  %v631_v54 = vld [vmem:[#allocation16 + $0x268] sm:$0xff] }
  0x83   :  { %542 = vmatpush.msrb.mxu3 %v433_v55 }
  0x84   :  { %523 = vmatpush.msrb.mxu2 %v399_v58  ;;  %v559_v58 = vld [vmem:[#allocation16 + $0x28] sm:$0xff] }
  0x85   :  { %543 = vmatpush.msrb.mxu3 %v431_v59  ;;  %v626_v59 = vld [vmem:[#allocation16 + $0x240] sm:$0xff] }
  0xbe   :  { %v265_v45 = vpop.f32.mrf.mxu0 }
  0xbf   :  { %v266_v46 = vadd.f32 %v1314_v44, %v265_v45 }
  0xc1   :  { %vm268_vm2 = vcmp.gt.f32.partialorder %v266_v46, 0.0  ;;  %v269_v47 = vmul.f32 0.1, %v266_v46 }
  0xc3   :  { %v270_v48 = vsel %vm268_vm2, %v266_v46, %v269_v47 }
  0xc4   :  { %307 = vmatmul.f32.vlgmr.msra.gmra.mxu1 %v270_v48  ;;  %v402_v48 = vld [vmem:[#allocation13 + $0x20] sm:$0xff] }
  0xc5   :  { %481 = vmatpush.msrb.mxu0 %v402_v48  ;;  %712 = vmatpush.msra.mxu1 %v678_v2  ;;  %v635_v48 = vld [vmem:[#allocation16 + $0x288] sm:$0xff] }
  0xc6   :  { %v555_v2 = vld [vmem:[#allocation16 + $0x8] sm:$0xff] }
  0xc7   :  { %482 = vmatpush.msrb.mxu0 %v400_v52  ;;  %713 = vmatpush.msra.mxu1 %v674_v4  ;;  %v617_v4 = vld [vmem:[#allocation16 + $0x1f8] sm:$0xff] }
  0xc9   :  { %483 = vmatpush.msrb.mxu0 %v398_v56  ;;  %714 = vmatpush.msra.mxu1 %v670_v8  ;;  %v613_v8 = vld [vmem:[#allocation16 + $0x1d8] sm:$0xff] }
  0xcb   :  { %692 = vmatpush.msra.mxu0 %v614_v60  ;;  %715 = vmatpush.msra.mxu1 %v666_v12  ;;  %v627_v60 = vld [vmem:[#allocation16 + $0x248] sm:$0xff]  ;;  %v609_v12 = vld [vmem:[#allocation16 + $0x1b8] sm:$0xff] }
  0xcd   :  { %693 = vmatpush.msra.mxu0 %v610_v62  ;;  %716 = vmatpush.msra.mxu1 %v662_v16  ;;  %v605_v16 = vld [vmem:[#allocation16 + $0x198] sm:$0xff] }
  0xcf   :  { %694 = vmatpush.msra.mxu0 %v606_v0  ;;  %717 = vmatpush.msra.mxu1 %v658_v20  ;;  %v601_v20 = vld [vmem:[#allocation16 + $0x178] sm:$0xff] }
  0xd1   :  { %695 = vmatpush.msra.mxu0 %v602_v5  ;;  %718 = vmatpush.msra.mxu1 %v654_v24  ;;  %v622_v5 = vld [vmem:[#allocation16 + $0x220] sm:$0xff]  ;;  %v597_v24 = vld [vmem:[#allocation16 + $0x158] sm:$0xff] }
  0xd3   :  { %696 = vmatpush.msra.mxu0 %v598_v10  ;;  %719 = vmatpush.msra.mxu1 %v650_v28  ;;  %v619_v10 = vld [vmem:[#allocation16 + $0x208] sm:$0xff]  ;;  %v593_v28 = vld [vmem:[#allocation16 + $0x138] sm:$0xff] }
  0xd5   :  { %697 = vmatpush.msra.mxu0 %v594_v14  ;;  %720 = vmatpush.msra.mxu1 %v646_v32  ;;  %v681_v14 = vld [vmem:[#allocation16 + $0x3f8] sm:$0xff] }
  0xd6   :  { %v589_v32 = vld [vmem:[#allocation16 + $0x118] sm:$0xff] }
  0xd7   :  { %698 = vmatpush.msra.mxu0 %v590_v18  ;;  %721 = vmatpush.msra.mxu1 %v642_v37  ;;  %v677_v18 = vld [vmem:[#allocation16 + $0x3d8] sm:$0xff]  ;;  %v580_v37 = vld [vmem:[#allocation16 + $0xd0] sm:$0xff] }
  0xd9   :  { %699 = vmatpush.msra.mxu0 %v586_v22  ;;  %v673_v22 = vld [vmem:[#allocation16 + $0x3b8] sm:$0xff] }
  0xdb   :  { %700 = vmatpush.msra.mxu0 %v582_v26  ;;  %v669_v26 = vld [vmem:[#allocation16 + $0x398] sm:$0xff] }
  0xdd   :  { %701 = vmatpush.msra.mxu0 %v578_v30  ;;  %v665_v30 = vld [vmem:[#allocation16 + $0x378] sm:$0xff] }
  0xdf   :  { %702 = vmatpush.msra.mxu0 %v574_v34  ;;  %v660_v34 = vld [vmem:[#allocation16 + $0x350] sm:$0xff] }
  0xe1   :  { %703 = vmatpush.msra.mxu0 %v570_v39  ;;  %v581_v39 = vld [vmem:[#allocation16 + $0xd8] sm:$0xff] }
 0x141   :  { %v308_v44 = vpop.f32.mrf.mxu1 }
 0x142   :  { %v309_v45 = vadd.f32 %v1315_v41, %v308_v44  ;;  %v638_v41 = vld [vmem:[#allocation16 + $0x2a0] sm:$0xff]  ;;  %v349_v44 = vperm.slane %v346_v36, 1  ;;  %v661_v36 = vld [vmem:[#allocation16 + $0x358] sm:$0xff] }
 0x143   :  { %722 = vmatpush.msra.mxu1 %v638_v41  ;;  %v576_v41 = vld [vmem:[#allocation16 + $0xb0] sm:$0xff] }
 0x144   :  { %vm311_vm3 = vcmp.gt.f32.partialorder %v309_v45, 0.0  ;;  %v312_v46 = vmul.f32 0.1, %v309_v45 }
 0x146   :  { %v313_v47 = vsel %vm311_vm3, %v309_v45, %v312_v46  ;;  %v566_v45 = vld [vmem:[#allocation16 + $0x60] sm:$0xff]  ;;  %v567_v46 = vld [vmem:[#allocation16 + $0x68] sm:$0xff] }
 0x147   :  { %368 = vmatmul.f32.vlgmr.msra.gmra.mxu2 %v313_v47  ;;  %388 = vmatmul.f32.vlgmr.msra.gmra.mxu3 %v313_v47  ;;  %v634_v47 = vld [vmem:[#allocation16 + $0x280] sm:$0xff] }
 0x148   :  { %732 = vmatpush.msra.mxu2 %v615_v61  ;;  %752 = vmatpush.msra.mxu3 %v679_v3  ;;  %v616_v3 = vld [vmem:[#allocation16 + $0x1f0] sm:$0xff] }
 0x149   :  { %704 = vmatpush.msra.mxu0 %v566_v45  ;;  %723 = vmatpush.msra.mxu1 %v634_v47  ;;  %v572_v45 = vld [vmem:[#allocation16 + $0x90] sm:$0xff]  ;;  %v573_v47 = vld [vmem:[#allocation16 + $0x98] sm:$0xff] }
 0x14a   :  { %733 = vmatpush.msra.mxu2 %v611_v63  ;;  %753 = vmatpush.msra.mxu3 %v675_v7  ;;  %v612_v7 = vld [vmem:[#allocation16 + $0x1d0] sm:$0xff] }
 0x14b   :  { %705 = vmatpush.msra.mxu0 %v562_v49  ;;  %724 = vmatpush.msra.mxu1 %v630_v53  ;;  %v568_v49 = vld [vmem:[#allocation16 + $0x70] sm:$0xff] }
 0x14c   :  { %734 = vmatpush.msra.mxu2 %v607_v1  ;;  %754 = vmatpush.msra.mxu3 %v671_v9  ;;  %v554_v1 = vld [vmem:[#allocation16] sm:$0xff]  ;;  %v564_v53 = vld [vmem:[#allocation16 + $0x50] sm:$0xff] }
 0x14d   :  { %706 = vmatpush.msra.mxu0 %v558_v57  ;;  %725 = vmatpush.msra.mxu1 %v626_v59  ;;  %v618_v9 = vld [vmem:[#allocation16 + $0x200] sm:$0xff]  ;;  %v560_v57 = vld [vmem:[#allocation16 + $0x30] sm:$0xff]  ;;  %v561_v59 = vld [vmem:[#allocation16 + $0x38] sm:$0xff] }
 0x14e   :  { %735 = vmatpush.msra.mxu2 %v603_v6  ;;  %755 = vmatpush.msra.mxu3 %v667_v13  ;;  %v623_v6 = vld [vmem:[#allocation16 + $0x228] sm:$0xff]  ;;  %v680_v13 = vld [vmem:[#allocation16 + $0x3f0] sm:$0xff] }
 0x14f   :  { %707 = vmatpush.msra.mxu0 %v554_v1  ;;  %726 = vmatpush.msra.mxu1 %v622_v5  ;;  %v628_v1 = vld [vmem:[#allocation16 + $0x250] sm:$0xff] }
 0x150   :  { %736 = vmatpush.msra.mxu2 %v599_v11  ;;  %756 = vmatpush.msra.mxu3 %v663_v17  ;;  %v608_v11 = vld [vmem:[#allocation16 + $0x1b0] sm:$0xff] }
 0x151   :  { %727 = vmatpush.msra.mxu1 %v618_v9  ;;  %v676_v17 = vld [vmem:[#allocation16 + $0x3d0] sm:$0xff] }
 0x152   :  { %737 = vmatpush.msra.mxu2 %v595_v15  ;;  %757 = vmatpush.msra.mxu3 %v659_v21  ;;  %v604_v15 = vld [vmem:[#allocation16 + $0x190] sm:$0xff] }
 0x153   :  { %v672_v21 = vld [vmem:[#allocation16 + $0x3b0] sm:$0xff] }
 0x154   :  { %738 = vmatpush.msra.mxu2 %v591_v19  ;;  %758 = vmatpush.msra.mxu3 %v655_v25  ;;  %v600_v19 = vld [vmem:[#allocation16 + $0x170] sm:$0xff] }
 0x155   :  { %v668_v25 = vld [vmem:[#allocation16 + $0x390] sm:$0xff] }
 0x156   :  { %739 = vmatpush.msra.mxu2 %v587_v23  ;;  %759 = vmatpush.msra.mxu3 %v651_v29  ;;  %v596_v23 = vld [vmem:[#allocation16 + $0x150] sm:$0xff] }
 0x157   :  { %v664_v29 = vld [vmem:[#allocation16 + $0x370] sm:$0xff] }
 0x158   :  { %740 = vmatpush.msra.mxu2 %v583_v27  ;;  %760 = vmatpush.msra.mxu3 %v647_v33  ;;  %v592_v27 = vld [vmem:[#allocation16 + $0x130] sm:$0xff] }
 0x159   :  { %v584_v33 = vld [vmem:[#allocation16 + $0xf0] sm:$0xff] }
 0x15a   :  { %741 = vmatpush.msra.mxu2 %v579_v31  ;;  %761 = vmatpush.msra.mxu3 %v643_v38  ;;  %v588_v31 = vld [vmem:[#allocation16 + $0x110] sm:$0xff] }
 0x15b   :  { %v656_v38 = vld [vmem:[#allocation16 + $0x330] sm:$0xff] }
 0x15c   :  { %742 = vmatpush.msra.mxu2 %v575_v35  ;;  %762 = vmatpush.msra.mxu3 %v639_v42  ;;  %v585_v35 = vld [vmem:[#allocation16 + $0xf8] sm:$0xff]  ;;  %v652_v42 = vld [vmem:[#allocation16 + $0x310] sm:$0xff] }
 0x15d   :  { %v620_v5 = vld [vmem:[#allocation16 + $0x210] sm:$0xff] }
 0x15e   :  { %743 = vmatpush.msra.mxu2 %v571_v40  ;;  %763 = vmatpush.msra.mxu3 %v635_v48  ;;  %v657_v40 = vld [vmem:[#allocation16 + $0x338] sm:$0xff] }
 0x15f   :  { %v649_v48 = vld [vmem:[#allocation16 + $0x2f8] sm:$0xff] }
 0x160   :  { %744 = vmatpush.msra.mxu2 %v567_v46  ;;  %764 = vmatpush.msra.mxu3 %v631_v54  ;;  %v648_v46 = vld [vmem:[#allocation16 + $0x2f0] sm:$0xff] }
 0x161   :  { %v640_v54 = vld [vmem:[#allocation16 + $0x2b0] sm:$0xff] }
 0x162   :  { %745 = vmatpush.msra.mxu2 %v563_v50  ;;  %765 = vmatpush.msra.mxu3 %v627_v60  ;;  %v644_v50 = vld [vmem:[#allocation16 + $0x2d0] sm:$0xff]  ;;  %v637_v60 = vld [vmem:[#allocation16 + $0x298] sm:$0xff] }
 0x164   :  { %746 = vmatpush.msra.mxu2 %v559_v58  ;;  %766 = vmatpush.msra.mxu3 %v623_v6  ;;  %v636_v58 = vld [vmem:[#allocation16 + $0x290] sm:$0xff]  ;;  %v621_v6 = vld [vmem:[#allocation16 + $0x218] sm:$0xff] }
 0x166   :  { %747 = vmatpush.msra.mxu2 %v555_v2  ;;  %767 = vmatpush.msra.mxu3 %v619_v10  ;;  %v629_v2 = vld [vmem:[#allocation16 + $0x258] sm:$0xff] }
 0x1ca   :  { %v369_v51 = vpop.f32.mrf.mxu2  ;;  %v389_v52 = vpop.f32.mrf.mxu3 }
 0x1cb   :  { %v370_v55 = vadd.f32 %v369_v51, %v348_v43  ;;  %v390_v56 = vadd.f32 %v389_v52, %v349_v44  ;;  %v577_v43 = vld [vmem:[#allocation16 + $0xb8] sm:$0xff] }
 0x1cc   :  { %v653_v44 = vld [vmem:[#allocation16 + $0x318] sm:$0xff] }
 0x1cd   :  { %v394_v61 = vmul.f32 0.1, %v370_v55  ;;  %v395_v62 = vmul.f32 0.1, %v390_v56  ;;  %vm392_vm4 = vcmp.gt.f32.partialorder %v370_v55, 0.0  ;;  %vm393_vm5 = vcmp.gt.f32.partialorder %v390_v56, 0.0 }
 0x1ce   :  { %v569_v51 = vld [vmem:[#allocation16 + $0x78] sm:$0xff] }
 0x1cf   :  { %v396_v63 = vsel %vm392_vm4, %v370_v55, %v394_v61  ;;  %v397_v0 = vsel %vm393_vm5, %v390_v56, %v395_v62  ;;  %v645_v52 = vld [vmem:[#allocation16 + $0x2d8] sm:$0xff]  ;;  %v556_v61 = vld [vmem:[#allocation16 + $0x10] sm:$0xff] }
 0x1d0   :  { %484 = vmatmul.f32.vlgmr.msrb.gmra.mxu0 %v396_v63  ;;  %504 = vmatmul.f32.vlgmr.msrb.gmra.mxu1 %v397_v0  ;;  %v565_v55 = vld [vmem:[#allocation16 + $0x58] sm:$0xff]  ;;  %v632_v62 = vld [vmem:[#allocation16 + $0x270] sm:$0xff] }
 0x1d1   :  { %524 = vmatmul.f32.vlgmr.msrb.gmra.mxu2 %v396_v63  ;;  %544 = vmatmul.f32.vlgmr.msrb.gmra.mxu3 %v397_v0  ;;  %v641_v56 = vld [vmem:[#allocation16 + $0x2b8] sm:$0xff] }
 0x1d2   :  { %772 = vmatpush.msrb.mxu0 %v616_v3  ;;  %812 = vmatpush.msrb.mxu2 %v617_v4  ;;  %v557_v63 = vld [vmem:[#allocation16 + $0x18] sm:$0xff]  ;;  %v624_v3 = vld [vmem:[#allocation16 + $0x230] sm:$0xff] }
 0x1d3   :  { %792 = vmatpush.msrb.mxu1 %v680_v13  ;;  %832 = vmatpush.msrb.mxu3 %v681_v14  ;;  %v633_v0 = vld [vmem:[#allocation16 + $0x278] sm:$0xff] }
 0x1d4   :  { %773 = vmatpush.msrb.mxu0 %v612_v7  ;;  %813 = vmatpush.msrb.mxu2 %v613_v8  ;;  %v625_v4 = vld [vmem:[#allocation16 + $0x238] sm:$0xff] }
 0x1d5   :  { %793 = vmatpush.msrb.mxu1 %v676_v17  ;;  %833 = vmatpush.msrb.mxu3 %v677_v18  ;;  %v462_v7 = vld [vmem:[#allocation14] sm:$0x3] }
 0x1d6   :  { %774 = vmatpush.msrb.mxu0 %v608_v11  ;;  %814 = vmatpush.msrb.mxu2 %v609_v12  ;;  %v464_v8 = vperm.slane %v462_v7, 0  ;;  %v465_v13 = vperm.slane %v462_v7, 1  ;;  %v970_v7 = vld [vmem:[#allocation17 + $0x350] sm:$0xff] }
 0x1d7   :  { %794 = vmatpush.msrb.mxu1 %v672_v21  ;;  %834 = vmatpush.msrb.mxu3 %v673_v22  ;;  %v956_v21 = vld [vmem:[#allocation17 + $0x2e0] sm:$0xff] }
 0x1d8   :  { %775 = vmatpush.msrb.mxu0 %v604_v15  ;;  %815 = vmatpush.msrb.mxu2 %v605_v16  ;;  %v894_v15 = vld [vmem:[#allocation17 + $0xf0] sm:$0xff] }
 0x1d9   :  { %795 = vmatpush.msrb.mxu1 %v668_v25  ;;  %835 = vmatpush.msrb.mxu3 %v669_v26  ;;  %v958_v16 = vld [vmem:[#allocation17 + $0x2f0] sm:$0xff] }
 0x1da   :  { %776 = vmatpush.msrb.mxu0 %v600_v19  ;;  %816 = vmatpush.msrb.mxu2 %v601_v20  ;;  %v892_v20 = vld [vmem:[#allocation17 + $0xe0] sm:$0xff]  ;;  %v954_v25 = vld [vmem:[#allocation17 + $0x2d0] sm:$0xff] }
 0x1db   :  { %796 = vmatpush.msrb.mxu1 %v664_v29  ;;  %836 = vmatpush.msrb.mxu3 %v665_v30  ;;  %v926_v29 = vld [vmem:[#allocation17 + $0x1f0] sm:$0xff]  ;;  %v952_v30 = vld [vmem:[#allocation17 + $0x2c0] sm:$0xff] }
 0x1dc   :  { %777 = vmatpush.msrb.mxu0 %v596_v23  ;;  %817 = vmatpush.msrb.mxu2 %v597_v24  ;;  %v890_v24 = vld [vmem:[#allocation17 + $0xd0] sm:$0xff] }
 0x1dd   :  { %797 = vmatpush.msrb.mxu1 %v660_v34  ;;  %837 = vmatpush.msrb.mxu3 %v661_v36  ;;  %v950_v34 = vld [vmem:[#allocation17 + $0x2b0] sm:$0xff]  ;;  %v884_v36 = vld [vmem:[#allocation17 + $0xa0] sm:$0xff] }
 0x1de   :  { %778 = vmatpush.msrb.mxu0 %v592_v27  ;;  %818 = vmatpush.msrb.mxu2 %v593_v28  ;;  %v888_v28 = vld [vmem:[#allocation17 + $0xc0] sm:$0xff] }
 0x1df   :  { %798 = vmatpush.msrb.mxu1 %v656_v38  ;;  %838 = vmatpush.msrb.mxu3 %v657_v40  ;;  %v948_v38 = vld [vmem:[#allocation17 + $0x2a0] sm:$0xff]  ;;  %v882_v40 = vld [vmem:[#allocation17 + $0x90] sm:$0xff] }
 0x1e0   :  { %779 = vmatpush.msrb.mxu0 %v588_v31  ;;  %819 = vmatpush.msrb.mxu2 %v589_v32  ;;  %v990_v31 = vld [vmem:[#allocation17 + $0x3f0] sm:$0xff] }
 0x1e1   :  { %799 = vmatpush.msrb.mxu1 %v652_v42  ;;  %839 = vmatpush.msrb.mxu3 %v653_v44  ;;  %v886_v32 = vld [vmem:[#allocation17 + $0xb0] sm:$0xff]  ;;  %v880_v44 = vld [vmem:[#allocation17 + $0x80] sm:$0xff] }
 0x1e2   :  { %780 = vmatpush.msrb.mxu0 %v584_v33  ;;  %820 = vmatpush.msrb.mxu2 %v585_v35  ;;  %v924_v33 = vld [vmem:[#allocation17 + $0x1e0] sm:$0xff]  ;;  %v946_v42 = vld [vmem:[#allocation17 + $0x290] sm:$0xff] }
 0x1e3   :  { %800 = vmatpush.msrb.mxu1 %v648_v46  ;;  %840 = vmatpush.msrb.mxu3 %v649_v48  ;;  %v988_v35 = vld [vmem:[#allocation17 + $0x3e0] sm:$0xff]  ;;  %v878_v48 = vld [vmem:[#allocation17 + $0x70] sm:$0xff] }
 0x1e4   :  { %781 = vmatpush.msrb.mxu0 %v580_v37  ;;  %821 = vmatpush.msrb.mxu2 %v581_v39  ;;  %v922_v37 = vld [vmem:[#allocation17 + $0x1d0] sm:$0xff]  ;;  %v944_v46 = vld [vmem:[#allocation17 + $0x280] sm:$0xff] }
 0x1e5   :  { %801 = vmatpush.msrb.mxu1 %v644_v50  ;;  %841 = vmatpush.msrb.mxu3 %v645_v52  ;;  %v986_v39 = vld [vmem:[#allocation17 + $0x3d0] sm:$0xff]  ;;  %v876_v52 = vld [vmem:[#allocation17 + $0x60] sm:$0xff] }
 0x1e6   :  { %782 = vmatpush.msrb.mxu0 %v576_v41  ;;  %822 = vmatpush.msrb.mxu2 %v577_v43  ;;  %v920_v41 = vld [vmem:[#allocation17 + $0x1c0] sm:$0xff]  ;;  %v942_v50 = vld [vmem:[#allocation17 + $0x270] sm:$0xff] }
 0x1e7   :  { %802 = vmatpush.msrb.mxu1 %v640_v54  ;;  %842 = vmatpush.msrb.mxu3 %v641_v56  ;;  %v984_v43 = vld [vmem:[#allocation17 + $0x3c0] sm:$0xff]  ;;  %v874_v56 = vld [vmem:[#allocation17 + $0x50] sm:$0xff] }
 0x1e8   :  { %783 = vmatpush.msrb.mxu0 %v572_v45  ;;  %823 = vmatpush.msrb.mxu2 %v573_v47  ;;  %v918_v45 = vld [vmem:[#allocation17 + $0x1b0] sm:$0xff]  ;;  %v940_v54 = vld [vmem:[#allocation17 + $0x260] sm:$0xff] }
 0x1e9   :  { %803 = vmatpush.msrb.mxu1 %v636_v58  ;;  %843 = vmatpush.msrb.mxu3 %v637_v60  ;;  %v982_v47 = vld [vmem:[#allocation17 + $0x3b0] sm:$0xff]  ;;  %v872_v60 = vld [vmem:[#allocation17 + $0x40] sm:$0xff] }
 0x1ea   :  { %784 = vmatpush.msrb.mxu0 %v568_v49  ;;  %824 = vmatpush.msrb.mxu2 %v569_v51  ;;  %v916_v49 = vld [vmem:[#allocation17 + $0x1a0] sm:$0xff]  ;;  %v938_v58 = vld [vmem:[#allocation17 + $0x250] sm:$0xff] }
 0x1eb   :  { %804 = vmatpush.msrb.mxu1 %v632_v62  ;;  %844 = vmatpush.msrb.mxu3 %v633_v0  ;;  %v980_v51 = vld [vmem:[#allocation17 + $0x3a0] sm:$0xff]  ;;  %v870_v0 = vld [vmem:[#allocation17 + $0x30] sm:$0xff] }
 0x1ec   :  { %785 = vmatpush.msrb.mxu0 %v564_v53  ;;  %825 = vmatpush.msrb.mxu2 %v565_v55  ;;  %v914_v53 = vld [vmem:[#allocation17 + $0x190] sm:$0xff]  ;;  %v936_v62 = vld [vmem:[#allocation17 + $0x240] sm:$0xff] }
 0x1ed   :  { %805 = vmatpush.msrb.mxu1 %v628_v1  ;;  %845 = vmatpush.msrb.mxu3 %v629_v2  ;;  %v978_v55 = vld [vmem:[#allocation17 + $0x390] sm:$0xff]  ;;  %v908_v1 = vld [vmem:[#allocation17 + $0x160] sm:$0xff] }
 0x1ee   :  { %786 = vmatpush.msrb.mxu0 %v560_v57  ;;  %826 = vmatpush.msrb.mxu2 %v561_v59  ;;  %v912_v57 = vld [vmem:[#allocation17 + $0x180] sm:$0xff]  ;;  %v934_v2 = vld [vmem:[#allocation17 + $0x230] sm:$0xff] }
 0x1ef   :  { %806 = vmatpush.msrb.mxu1 %v624_v3  ;;  %846 = vmatpush.msrb.mxu3 %v625_v4  ;;  %v976_v59 = vld [vmem:[#allocation17 + $0x380] sm:$0xff] }
 0x1f0   :  { %787 = vmatpush.msrb.mxu0 %v556_v61  ;;  %827 = vmatpush.msrb.mxu2 %v557_v63  ;;  %v910_v61 = vld [vmem:[#allocation17 + $0x170] sm:$0xff]  ;;  %v972_v3 = vld [vmem:[#allocation17 + $0x360] sm:$0xff] }
 0x1f1   :  { %807 = vmatpush.msrb.mxu1 %v620_v5  ;;  %847 = vmatpush.msrb.mxu3 %v621_v6  ;;  %v974_v63 = vld [vmem:[#allocation17 + $0x370] sm:$0xff]  ;;  %v868_v4 = vld [vmem:[#allocation17 + $0x20] sm:$0xff] }
 0x1f2   :  { %v906_v5 = vld [vmem:[#allocation17 + $0x150] sm:$0xff]  ;;  %v932_v6 = vld [vmem:[#allocation17 + $0x220] sm:$0xff] }
 0x24d   :  { %v485_v9 = vpop.f32.mrf.mxu0  ;;  %v505_v11 = vpop.f32.mrf.mxu1 }
 0x24e   :  { %v486_v10 = vadd.f32 %v485_v9, %v464_v8  ;;  %v866_v8 = vld [vmem:[#allocation17 + $0x10] sm:$0xff]  ;;  %v904_v9 = vld [vmem:[#allocation17 + $0x140] sm:$0xff] }
 0x250   :  { %v506_v12 = vadd.f32 %v505_v11, %v486_v10  ;;  %v930_v10 = vld [vmem:[#allocation17 + $0x210] sm:$0xff]  ;;  %v968_v11 = vld [vmem:[#allocation17 + $0x340] sm:$0xff] }
 0x252   :  { %vm548_vm6 = vcmp.gt.f32.partialorder %v506_v12, 0.0  ;;  %v550_v14 = vmul.f32 0.1, %v506_v12 }
 0x254   :  { %v525_v17 = vpop.f32.mrf.mxu2  ;;  %v552_v18 = vsel %vm548_vm6, %v506_v12, %v550_v14  ;;  %v545_v22 = vpop.f32.mrf.mxu3  ;;  %v864_v12 = vld [vmem:[#allocation17] sm:$0xff]  ;;  %v895_v14 = vld [vmem:[#allocation17 + $0xf8] sm:$0xff] }
 0x255   :  { %v526_v19 = vadd.f32 %v525_v17, %v465_v13  ;;  %708 = vmatmul.f32.vlgmr.msra.gmra.mxu0 %v552_v18  ;;  %748 = vmatmul.f32.vlgmr.msra.gmra.mxu2 %v552_v18  ;;  %v902_v13 = vld [vmem:[#allocation17 + $0x130] sm:$0xff] }
 0x256   :  { %998 = vmatpush.msra.mxu0 %v894_v15  ;;  %1038 = vmatpush.msra.mxu2 %v958_v16  ;;  %v928_v15 = vld [vmem:[#allocation17 + $0x200] sm:$0xff]  ;;  %v966_v17 = vld [vmem:[#allocation17 + $0x330] sm:$0xff] }
 0x257   :  { %v546_v23 = vadd.f32 %v545_v22, %v526_v19  ;;  %v900_v16 = vld [vmem:[#allocation17 + $0x120] sm:$0xff]  ;;  %v959_v19 = vld [vmem:[#allocation17 + $0x2f8] sm:$0xff] }
 0x258   :  { %999 = vmatpush.msra.mxu0 %v892_v20  ;;  %1039 = vmatpush.msra.mxu2 %v956_v21  ;;  %v898_v20 = vld [vmem:[#allocation17 + $0x110] sm:$0xff]  ;;  %v964_v21 = vld [vmem:[#allocation17 + $0x320] sm:$0xff]  ;;  %v891_v22 = vld [vmem:[#allocation17 + $0xd8] sm:$0xff] }
 0x259   :  { %vm549_vm7 = vcmp.gt.f32.partialorder %v546_v23, 0.0  ;;  %v551_v26 = vmul.f32 0.1, %v546_v23 }
 0x25a   :  { %1000 = vmatpush.msra.mxu0 %v890_v24  ;;  %1040 = vmatpush.msra.mxu2 %v954_v25  ;;  %v896_v24 = vld [vmem:[#allocation17 + $0x100] sm:$0xff]  ;;  %v889_v25 = vld [vmem:[#allocation17 + $0xc8] sm:$0xff] }
 0x25b   :  { %v553_v27 = vsel %vm549_vm7, %v546_v23, %v551_v26  ;;  %v957_v23 = vld [vmem:[#allocation17 + $0x2e8] sm:$0xff]  ;;  %v927_v26 = vld [vmem:[#allocation17 + $0x1f8] sm:$0xff] }
 0x25c   :  { %728 = vmatmul.f32.vlgmr.msra.gmra.mxu1 %v553_v27  ;;  %768 = vmatmul.f32.vlgmr.msra.gmra.mxu3 %v553_v27 }
 0x25d   :  { %788 = vmatmul.f32.vlgmr.msrb.gmra.mxu0 %v552_v18  ;;  %828 = vmatmul.f32.vlgmr.msrb.gmra.mxu2 %v552_v18  ;;  %v893_v18 = vld [vmem:[#allocation17 + $0xe8] sm:$0xff] }
 0x25e   :  { %1001 = vmatpush.msra.mxu0 %v888_v28  ;;  %1018 = vmatpush.msra.mxu1 %v926_v29  ;;  %v925_v28 = vld [vmem:[#allocation17 + $0x1e8] sm:$0xff] }
 0x25f   :  { %1041 = vmatpush.msra.mxu2 %v952_v30  ;;  %1058 = vmatpush.msra.mxu3 %v990_v31  ;;  %v885_v29 = vld [vmem:[#allocation17 + $0xa8] sm:$0xff]  ;;  %v923_v30 = vld [vmem:[#allocation17 + $0x1d8] sm:$0xff]  ;;  %v962_v31 = vld [vmem:[#allocation17 + $0x310] sm:$0xff] }
 0x260   :  { %1002 = vmatpush.msra.mxu0 %v886_v32  ;;  %1019 = vmatpush.msra.mxu1 %v924_v33  ;;  %v883_v32 = vld [vmem:[#allocation17 + $0x98] sm:$0xff]  ;;  %v921_v33 = vld [vmem:[#allocation17 + $0x1c8] sm:$0xff] }
 0x261   :  { %1042 = vmatpush.msra.mxu2 %v950_v34  ;;  %1059 = vmatpush.msra.mxu3 %v988_v35  ;;  %v955_v34 = vld [vmem:[#allocation17 + $0x2d8] sm:$0xff]  ;;  %v960_v35 = vld [vmem:[#allocation17 + $0x300] sm:$0xff] }
 0x262   :  { %1003 = vmatpush.msra.mxu0 %v884_v36  ;;  %1020 = vmatpush.msra.mxu1 %v922_v37  ;;  %v881_v36 = vld [vmem:[#allocation17 + $0x88] sm:$0xff]  ;;  %v919_v37 = vld [vmem:[#allocation17 + $0x1b8] sm:$0xff] }
 0x263   :  { %1043 = vmatpush.msra.mxu2 %v948_v38  ;;  %1060 = vmatpush.msra.mxu3 %v986_v39  ;;  %v953_v38 = vld [vmem:[#allocation17 + $0x2c8] sm:$0xff]  ;;  %v991_v39 = vld [vmem:[#allocation17 + $0x3f8] sm:$0xff] }
 0x264   :  { %808 = vmatmul.f32.vlgmr.msrb.gmra.mxu1 %v553_v27  ;;  %848 = vmatmul.f32.vlgmr.msrb.gmra.mxu3 %v553_v27  ;;  %v887_v27 = vld [vmem:[#allocation17 + $0xb8] sm:$0xff] }
 0x265   :  { %1004 = vmatpush.msra.mxu0 %v882_v40  ;;  %1021 = vmatpush.msra.mxu1 %v920_v41  ;;  %v879_v40 = vld [vmem:[#allocation17 + $0x78] sm:$0xff]  ;;  %v917_v41 = vld [vmem:[#allocation17 + $0x1a8] sm:$0xff] }
 0x266   :  { %1044 = vmatpush.msra.mxu2 %v946_v42  ;;  %1061 = vmatpush.msra.mxu3 %v984_v43  ;;  %v951_v42 = vld [vmem:[#allocation17 + $0x2b8] sm:$0xff]  ;;  %v989_v43 = vld [vmem:[#allocation17 + $0x3e8] sm:$0xff] }
 0x267   :  { %1005 = vmatpush.msra.mxu0 %v880_v44  ;;  %1022 = vmatpush.msra.mxu1 %v918_v45  ;;  %v877_v44 = vld [vmem:[#allocation17 + $0x68] sm:$0xff]  ;;  %v915_v45 = vld [vmem:[#allocation17 + $0x198] sm:$0xff] }
 0x268   :  { %1045 = vmatpush.msra.mxu2 %v944_v46  ;;  %1062 = vmatpush.msra.mxu3 %v982_v47  ;;  %v949_v46 = vld [vmem:[#allocation17 + $0x2a8] sm:$0xff]  ;;  %v987_v47 = vld [vmem:[#allocation17 + $0x3d8] sm:$0xff] }
 0x269   :  { %1006 = vmatpush.msra.mxu0 %v878_v48  ;;  %1023 = vmatpush.msra.mxu1 %v916_v49  ;;  %v875_v48 = vld [vmem:[#allocation17 + $0x58] sm:$0xff]  ;;  %v913_v49 = vld [vmem:[#allocation17 + $0x188] sm:$0xff] }
 0x26a   :  { %1046 = vmatpush.msra.mxu2 %v942_v50  ;;  %1063 = vmatpush.msra.mxu3 %v980_v51  ;;  %v947_v50 = vld [vmem:[#allocation17 + $0x298] sm:$0xff]  ;;  %v985_v51 = vld [vmem:[#allocation17 + $0x3c8] sm:$0xff] }
 0x26b   :  { %1007 = vmatpush.msra.mxu0 %v876_v52  ;;  %1024 = vmatpush.msra.mxu1 %v914_v53  ;;  %v873_v52 = vld [vmem:[#allocation17 + $0x48] sm:$0xff]  ;;  %v911_v53 = vld [vmem:[#allocation17 + $0x178] sm:$0xff] }
 0x26c   :  { %1047 = vmatpush.msra.mxu2 %v940_v54  ;;  %1064 = vmatpush.msra.mxu3 %v978_v55  ;;  %v945_v54 = vld [vmem:[#allocation17 + $0x288] sm:$0xff]  ;;  %v983_v55 = vld [vmem:[#allocation17 + $0x3b8] sm:$0xff] }
 0x26d   :  { %1008 = vmatpush.msra.mxu0 %v874_v56  ;;  %1025 = vmatpush.msra.mxu1 %v912_v57  ;;  %v871_v56 = vld [vmem:[#allocation17 + $0x38] sm:$0xff]  ;;  %v909_v57 = vld [vmem:[#allocation17 + $0x168] sm:$0xff] }
 0x26e   :  { %1048 = vmatpush.msra.mxu2 %v938_v58  ;;  %1065 = vmatpush.msra.mxu3 %v976_v59  ;;  %v943_v58 = vld [vmem:[#allocation17 + $0x278] sm:$0xff]  ;;  %v981_v59 = vld [vmem:[#allocation17 + $0x3a8] sm:$0xff] }
 0x26f   :  { %1009 = vmatpush.msra.mxu0 %v872_v60  ;;  %1026 = vmatpush.msra.mxu1 %v910_v61  ;;  %v869_v60 = vld [vmem:[#allocation17 + $0x28] sm:$0xff]  ;;  %v907_v61 = vld [vmem:[#allocation17 + $0x158] sm:$0xff] }
 0x270   :  { %1049 = vmatpush.msra.mxu2 %v936_v62  ;;  %1066 = vmatpush.msra.mxu3 %v974_v63  ;;  %v941_v62 = vld [vmem:[#allocation17 + $0x268] sm:$0xff]  ;;  %v979_v63 = vld [vmem:[#allocation17 + $0x398] sm:$0xff] }
 0x271   :  { %1010 = vmatpush.msra.mxu0 %v870_v0  ;;  %1027 = vmatpush.msra.mxu1 %v908_v1  ;;  %v867_v0 = vld [vmem:[#allocation17 + $0x18] sm:$0xff]  ;;  %v905_v1 = vld [vmem:[#allocation17 + $0x148] sm:$0xff] }
 0x272   :  { %1050 = vmatpush.msra.mxu2 %v934_v2  ;;  %1067 = vmatpush.msra.mxu3 %v972_v3  ;;  %v939_v2 = vld [vmem:[#allocation17 + $0x258] sm:$0xff]  ;;  %v977_v3 = vld [vmem:[#allocation17 + $0x388] sm:$0xff] }
 0x273   :  { %1011 = vmatpush.msra.mxu0 %v868_v4  ;;  %1028 = vmatpush.msra.mxu1 %v906_v5  ;;  %v865_v4 = vld [vmem:[#allocation17 + $0x8] sm:$0xff]  ;;  %v903_v5 = vld [vmem:[#allocation17 + $0x138] sm:$0xff] }
 0x274   :  { %1051 = vmatpush.msra.mxu2 %v932_v6  ;;  %1068 = vmatpush.msra.mxu3 %v970_v7  ;;  %v937_v6 = vld [vmem:[#allocation17 + $0x248] sm:$0xff]  ;;  %v975_v7 = vld [vmem:[#allocation17 + $0x378] sm:$0xff] }
 0x275   :  { %1012 = vmatpush.msra.mxu0 %v866_v8  ;;  %1029 = vmatpush.msra.mxu1 %v904_v9  ;;  %v901_v8 = vld [vmem:[#allocation17 + $0x128] sm:$0xff]  ;;  %v935_v9 = vld [vmem:[#allocation17 + $0x238] sm:$0xff] }
 0x276   :  { %1052 = vmatpush.msra.mxu2 %v930_v10  ;;  %1069 = vmatpush.msra.mxu3 %v968_v11  ;;  %v973_v10 = vld [vmem:[#allocation17 + $0x368] sm:$0xff]  ;;  %v899_v11 = vld [vmem:[#allocation17 + $0x118] sm:$0xff] }
 0x277   :  { %1013 = vmatpush.msra.mxu0 %v864_v12  ;;  %1030 = vmatpush.msra.mxu1 %v902_v13  ;;  %v933_v12 = vld [vmem:[#allocation17 + $0x228] sm:$0xff]  ;;  %v971_v13 = vld [vmem:[#allocation17 + $0x358] sm:$0xff] }
 0x278   :  { %1053 = vmatpush.msra.mxu2 %v928_v15  ;;  %1070 = vmatpush.msra.mxu3 %v966_v17  ;;  %v931_v15 = vld [vmem:[#allocation17 + $0x218] sm:$0xff]  ;;  %v929_v17 = vld [vmem:[#allocation17 + $0x208] sm:$0xff] }
 0x279   :  { %1078 = vmatpush.msrb.mxu0 %v895_v14  ;;  %1031 = vmatpush.msra.mxu1 %v900_v16  ;;  %v897_v14 = vld [vmem:[#allocation17 + $0x108] sm:$0xff] }
 0x27a   :  { %1118 = vmatpush.msrb.mxu2 %v959_v19  ;;  %1071 = vmatpush.msra.mxu3 %v964_v21  ;;  %v969_v16 = vld [vmem:[#allocation17 + $0x348] sm:$0xff] }
 0x27b   :  { %1079 = vmatpush.msrb.mxu0 %v893_v18  ;;  %1032 = vmatpush.msra.mxu1 %v898_v20  ;;  %v967_v18 = vld [vmem:[#allocation17 + $0x338] sm:$0xff]  ;;  %v965_v19 = vld [vmem:[#allocation17 + $0x328] sm:$0xff] }
 0x27c   :  { %1119 = vmatpush.msrb.mxu2 %v957_v23  ;;  %1072 = vmatpush.msra.mxu3 %v962_v31  ;;  %v963_v20 = vld [vmem:[#allocation17 + $0x318] sm:$0xff]  ;;  %v682_v21 = vld [vmem:[%s1852_s10] sm:$0xf] }
 0x27d   :  { %1080 = vmatpush.msrb.mxu0 %v891_v22  ;;  %1033 = vmatpush.msra.mxu1 %v896_v24  ;;  %v961_v22 = vld [vmem:[#allocation17 + $0x308] sm:$0xff]  ;;  %v684_v24 = vperm.slane %v682_v21, 0  ;;  %v686_v31 = vperm.slane %v682_v21, 2 }
 0x27e   :  { %1120 = vmatpush.msrb.mxu2 %v955_v34  ;;  %1073 = vmatpush.msra.mxu3 %v960_v35 }
 0x27f   :  { %1081 = vmatpush.msrb.mxu0 %v889_v25  ;;  %1098 = vmatpush.msrb.mxu1 %v927_v26 }
 0x280   :  { %1121 = vmatpush.msrb.mxu2 %v953_v38  ;;  %1138 = vmatpush.msrb.mxu3 %v991_v39 }
 0x281   :  { %1082 = vmatpush.msrb.mxu0 %v887_v27  ;;  %1099 = vmatpush.msrb.mxu1 %v925_v28 }
 0x282   :  { %1122 = vmatpush.msrb.mxu2 %v951_v42  ;;  %1139 = vmatpush.msrb.mxu3 %v989_v43 }
 0x283   :  { %1083 = vmatpush.msrb.mxu0 %v885_v29  ;;  %1100 = vmatpush.msrb.mxu1 %v923_v30  ;;  %v685_v29 = vperm.slane %v682_v21, 1 }
 0x284   :  { %1123 = vmatpush.msrb.mxu2 %v949_v46  ;;  %1140 = vmatpush.msrb.mxu3 %v987_v47 }
 0x285   :  { %1084 = vmatpush.msrb.mxu0 %v883_v32  ;;  %1101 = vmatpush.msrb.mxu1 %v921_v33 }
 0x286   :  { %1124 = vmatpush.msrb.mxu2 %v947_v50  ;;  %1141 = vmatpush.msrb.mxu3 %v985_v51  ;;  %v1176_v51 = vld [vmem:[#allocation19 + $0x78] sm:$0xff] }
 0x287   :  { %1085 = vmatpush.msrb.mxu0 %v881_v36  ;;  %1102 = vmatpush.msrb.mxu1 %v919_v37 }
 0x288   :  { %1125 = vmatpush.msrb.mxu2 %v945_v54  ;;  %1142 = vmatpush.msrb.mxu3 %v983_v55  ;;  %v1173_v54 = vld [vmem:[#allocation19 + $0x60] sm:$0xff]  ;;  %v1172_v55 = vld [vmem:[#allocation19 + $0x58] sm:$0xff] }
 0x289   :  { %1086 = vmatpush.msrb.mxu0 %v879_v40  ;;  %1103 = vmatpush.msrb.mxu1 %v917_v41  ;;  %v687_v41 = vperm.slane %v682_v21, 3 }
 0x28a   :  { %1126 = vmatpush.msrb.mxu2 %v943_v58  ;;  %1143 = vmatpush.msrb.mxu3 %v981_v59  ;;  %v1169_v58 = vld [vmem:[#allocation19 + $0x40] sm:$0xff]  ;;  %v1168_v59 = vld [vmem:[#allocation19 + $0x38] sm:$0xff] }
 0x28b   :  { %1087 = vmatpush.msrb.mxu0 %v877_v44  ;;  %1104 = vmatpush.msrb.mxu1 %v915_v45 }
 0x28c   :  { %1127 = vmatpush.msrb.mxu2 %v941_v62  ;;  %1144 = vmatpush.msrb.mxu3 %v979_v63  ;;  %v1165_v62 = vld [vmem:[#allocation19 + $0x20] sm:$0xff]  ;;  %v1164_v63 = vld [vmem:[#allocation19 + $0x18] sm:$0xff] }
 0x28d   :  { %1088 = vmatpush.msrb.mxu0 %v875_v48  ;;  %1105 = vmatpush.msrb.mxu1 %v913_v49 }
 0x28e   :  { %1128 = vmatpush.msrb.mxu2 %v939_v2  ;;  %1145 = vmatpush.msrb.mxu3 %v977_v3  ;;  %v1161_v2 = vld [vmem:[#allocation19] sm:$0xff]  ;;  %v1219_v3 = vld [vmem:[#allocation20 + $0x78] sm:$0xff] }
 0x28f   :  { %1089 = vmatpush.msrb.mxu0 %v873_v52  ;;  %1106 = vmatpush.msrb.mxu1 %v911_v53  ;;  %v1175_v52 = vld [vmem:[#allocation19 + $0x70] sm:$0xff]  ;;  %v1174_v53 = vld [vmem:[#allocation19 + $0x68] sm:$0xff] }
 0x290   :  { %1129 = vmatpush.msrb.mxu2 %v937_v6  ;;  %1146 = vmatpush.msrb.mxu3 %v975_v7  ;;  %v992_v6 = vld [vmem:[%s1854_s12] sm:$0x3] }
 0x291   :  { %1090 = vmatpush.msrb.mxu0 %v871_v56  ;;  %1107 = vmatpush.msrb.mxu1 %v909_v57  ;;  %v1171_v56 = vld [vmem:[#allocation19 + $0x50] sm:$0xff]  ;;  %v1170_v57 = vld [vmem:[#allocation19 + $0x48] sm:$0xff] }
 0x292   :  { %1130 = vmatpush.msrb.mxu2 %v935_v9  ;;  %1147 = vmatpush.msrb.mxu3 %v973_v10  ;;  %v1244_v10 = vlaneseq }
 0x293   :  { %1091 = vmatpush.msrb.mxu0 %v869_v60  ;;  %1108 = vmatpush.msrb.mxu1 %v907_v61  ;;  %v1167_v60 = vld [vmem:[#allocation19 + $0x30] sm:$0xff]  ;;  %v1166_v61 = vld [vmem:[#allocation19 + $0x28] sm:$0xff] }
 0x294   :  { %1131 = vmatpush.msrb.mxu2 %v933_v12  ;;  %1148 = vmatpush.msrb.mxu3 %v971_v13  ;;  %v1822_v13 = vand.u32 127, %v1244_v10 }
 0x295   :  { %1092 = vmatpush.msrb.mxu0 %v867_v0  ;;  %1109 = vmatpush.msrb.mxu1 %v905_v1  ;;  %v1163_v0 = vld [vmem:[#allocation19 + $0x10] sm:$0xff]  ;;  %v1162_v1 = vld [vmem:[#allocation19 + $0x8] sm:$0xff] }
 0x296   :  { %1132 = vmatpush.msrb.mxu2 %v931_v15  ;;  %1149 = vmatpush.msrb.mxu3 %v969_v16  ;;  %v995_v15 = vperm.slane %v992_v6, 1  ;;  %vm1246_vm12 = vcmp.lt.s32.totalorder %v1822_v13, 5  ;;  %vm1247_vm15 = vcmp.ge.s32.totalorder %v1822_v13, 10  ;;  %vm1248_vm0 = vcmp.lt.s32.totalorder %v1822_v13, 15 }
 0x297   :  { %1093 = vmatpush.msrb.mxu0 %v865_v4  ;;  %1110 = vmatpush.msrb.mxu1 %v903_v5  ;;  %v1218_v4 = vld [vmem:[#allocation20 + $0x70] sm:$0xff]  ;;  %v1217_v5 = vld [vmem:[#allocation20 + $0x68] sm:$0xff]  ;;  %vm1249_vm1 = vmand %vm1247_vm15, %vm1248_vm0 }
 0x298   :  { %1133 = vmatpush.msrb.mxu2 %v929_v17  ;;  %1150 = vmatpush.msrb.mxu3 %v967_v18 }
 0x299   :  { %1111 = vmatpush.msrb.mxu1 %v901_v8  ;;  %v994_v8 = vperm.slane %v992_v6, 0 }
 0x29a   :  { %1151 = vmatpush.msrb.mxu3 %v965_v19 }
 0x29b   :  { %1112 = vmatpush.msrb.mxu1 %v899_v11 }
 0x29c   :  { %1152 = vmatpush.msrb.mxu3 %v963_v20 }
 0x29d   :  { %1113 = vmatpush.msrb.mxu1 %v897_v14 }
 0x29e   :  { %1153 = vmatpush.msrb.mxu3 %v961_v22 }
 0x2d2   :  { %v709_v23 = vpop.f32.mrf.mxu0 }
 0x2d3   :  { %v710_v25 = vadd.f32 %v709_v23, %v684_v24 }
 0x2d8   :  { %v749_v27 = vpop.f32.mrf.mxu2 }
 0x2d9   :  { %v729_v26 = vpop.f32.mrf.mxu1  ;;  %v750_v33 = vadd.f32 %v749_v27, %v685_v29 }
 0x2da   :  { %v730_v28 = vadd.f32 %v729_v26, %v710_v25  ;;  %v789_v32 = vpop.f32.mrf.mxu0 }
 0x2db   :  { %v790_v36 = vadd.f32 %v789_v32, %v686_v31  ;;  %v1215_v31 = vld [vmem:[#allocation20 + $0x58] sm:$0xff]  ;;  %v1214_v32 = vld [vmem:[#allocation20 + $0x50] sm:$0xff] }
 0x2dc   :  { %vm852_vm8 = vcmp.gt.f32.partialorder %v730_v28, 0.0  ;;  %v856_v30 = vmul.f32 0.1, %v730_v28 }
 0x2de   :  { %v860_v34 = vsel %vm852_vm8, %v730_v28, %v856_v30  ;;  %v1216_v30 = vld [vmem:[#allocation20 + $0x60] sm:$0xff] }
 0x2df   :  { %v769_v35 = vpop.f32.mrf.mxu3  ;;  %1014 = vmatmul.f32.vlgmr.msra.gmra.mxu0 %v860_v34 }
 0x2e0   :  { %v770_v37 = vadd.f32 %v769_v35, %v750_v33  ;;  %v829_v42 = vpop.f32.mrf.mxu2  ;;  %1181 = vmatpush.msra.mxu0 %v1176_v51  ;;  %v1213_v33 = vld [vmem:[#allocation20 + $0x48] sm:$0xff]  ;;  %v1211_v35 = vld [vmem:[#allocation20 + $0x38] sm:$0xff] }
 0x2e1   :  { %v809_v38 = vpop.f32.mrf.mxu1  ;;  %v830_v45 = vadd.f32 %v829_v42, %v687_v41  ;;  %v1205_v41 = vld [vmem:[#allocation20 + $0x8] sm:$0xff]  ;;  %v1204_v42 = vld [vmem:[#allocation20] sm:$0xff] }
 0x2e2   :  { %vm853_vm9 = vcmp.gt.f32.partialorder %v770_v37, 0.0  ;;  %v857_v39 = vmul.f32 0.1, %v770_v37  ;;  %v810_v40 = vadd.f32 %v809_v38, %v790_v36  ;;  %1182 = vmatpush.msra.mxu0 %v1175_v52  ;;  %v1210_v36 = vld [vmem:[#allocation20 + $0x30] sm:$0xff]  ;;  %v1208_v38 = vld [vmem:[#allocation20 + $0x20] sm:$0xff] }
 0x2e4   :  { %vm854_vm10 = vcmp.gt.f32.partialorder %v810_v40, 0.0  ;;  %v858_v43 = vmul.f32 0.1, %v810_v40  ;;  %v861_v44 = vsel %vm853_vm9, %v770_v37, %v857_v39  ;;  %1183 = vmatpush.msra.mxu0 %v1174_v53  ;;  %v1209_v37 = vld [vmem:[#allocation20 + $0x28] sm:$0xff]  ;;  %v1207_v39 = vld [vmem:[#allocation20 + $0x18] sm:$0xff] }
 0x2e5   :  { %1034 = vmatmul.f32.vlgmr.msra.gmra.mxu1 %v861_v44 }
 0x2e6   :  { %v862_v46 = vsel %vm854_vm10, %v810_v40, %v858_v43  ;;  %1184 = vmatpush.msra.mxu0 %v1173_v54  ;;  %1224 = vmatpush.msra.mxu1 %v1219_v3  ;;  %v1206_v40 = vld [vmem:[#allocation20 + $0x10] sm:$0xff] }
 0x2e7   :  { %v849_v47 = vpop.f32.mrf.mxu3  ;;  %1054 = vmatmul.f32.vlgmr.msra.gmra.mxu2 %v862_v46  ;;  %1094 = vmatmul.f32.vlgmr.msrb.gmra.mxu0 %v860_v34  ;;  %v1212_v34 = vld [vmem:[#allocation20 + $0x40] sm:$0xff] }
 0x2e8   :  { %v850_v48 = vadd.f32 %v849_v47, %v830_v45  ;;  %1185 = vmatpush.msra.mxu0 %v1172_v55  ;;  %1225 = vmatpush.msra.mxu1 %v1218_v4 }
 0x2ea   :  { %vm855_vm11 = vcmp.gt.f32.partialorder %v850_v48, 0.0  ;;  %v859_v49 = vmul.f32 0.1, %v850_v48  ;;  %1186 = vmatpush.msra.mxu0 %v1171_v56  ;;  %1226 = vmatpush.msra.mxu1 %v1217_v5 }
 0x2ec   :  { %v863_v50 = vsel %vm855_vm11, %v850_v48, %v859_v49  ;;  %1187 = vmatpush.msra.mxu0 %v1170_v57  ;;  %1227 = vmatpush.msra.mxu1 %v1216_v30  ;;  %v1316_v48 = vld [vmem:[%s1856_s14] ss:$0 sm:$0xff] }
 0x2ed   :  { %1074 = vmatmul.f32.vlgmr.msra.gmra.mxu3 %v863_v50  ;;  %1114 = vmatmul.f32.vlgmr.msrb.gmra.mxu1 %v861_v44 }
 0x2ee   :  { %1188 = vmatpush.msra.mxu0 %v1169_v58  ;;  %1228 = vmatpush.msra.mxu1 %v1215_v31 }
 0x2ef   :  { %1134 = vmatmul.f32.vlgmr.msrb.gmra.mxu2 %v862_v46 }
 0x2f0   :  { %1189 = vmatpush.msra.mxu0 %v1168_v59  ;;  %1229 = vmatpush.msra.mxu1 %v1214_v32  ;;  %v1317_v59 = vld [vmem:[%s1858_s16] ss:$0 sm:$0xff] }
 0x2f2   :  { %1190 = vmatpush.msra.mxu0 %v1167_v60  ;;  %1230 = vmatpush.msra.mxu1 %v1213_v33 }
 0x2f4   :  { %1191 = vmatpush.msra.mxu0 %v1166_v61  ;;  %1231 = vmatpush.msra.mxu1 %v1212_v34 }
 0x2f5   :  { %1154 = vmatmul.f32.vlgmr.msrb.gmra.mxu3 %v863_v50 }
 0x2f6   :  { %1192 = vmatpush.msra.mxu0 %v1165_v62  ;;  %1232 = vmatpush.msra.mxu1 %v1211_v35 }
 0x2f8   :  { %1193 = vmatpush.msra.mxu0 %v1164_v63  ;;  %1233 = vmatpush.msra.mxu1 %v1210_v36 }
 0x2fa   :  { %1194 = vmatpush.msra.mxu0 %v1163_v0  ;;  %1234 = vmatpush.msra.mxu1 %v1209_v37 }
 0x2fc   :  { %1195 = vmatpush.msra.mxu0 %v1162_v1  ;;  %1235 = vmatpush.msra.mxu1 %v1208_v38 }
 0x2fe   :  { %1196 = vmatpush.msra.mxu0 %v1161_v2  ;;  %1236 = vmatpush.msra.mxu1 %v1207_v39 }
 0x300   :  { %1237 = vmatpush.msra.mxu1 %v1206_v40 }
 0x302   :  { %1238 = vmatpush.msra.mxu1 %v1205_v41 }
 0x304   :  { %1239 = vmatpush.msra.mxu1 %v1204_v42 }
 0x35c   :  { %v1015_v7 = vpop.f32.mrf.mxu0 }
 0x35d   :  { %v1016_v12 = vadd.f32 %v1015_v7, %v994_v8 }
 0x362   :  { %v1035_v9 = vpop.f32.mrf.mxu1 }
 0x363   :  { %v1036_v14 = vadd.f32 %v1035_v9, %v1016_v12 }
 0x364   :  { %v1095_v17 = vpop.f32.mrf.mxu0 }
 0x365   :  { %v1096_v21 = vadd.f32 %v1095_v17, %v995_v15 }
 0x36a   :  { %v1055_v11 = vpop.f32.mrf.mxu2  ;;  %v1115_v20 = vpop.f32.mrf.mxu1 }
 0x36b   :  { %v1056_v16 = vadd.f32 %v1055_v11, %v1036_v14  ;;  %v1116_v24 = vadd.f32 %v1115_v20, %v1096_v21 }
 0x370   :  { %v1075_v18 = vpop.f32.mrf.mxu3 }
 0x371   :  { %v1076_v19 = vadd.f32 %v1075_v18, %v1056_v16 }
 0x372   :  { %v1135_v23 = vpop.f32.mrf.mxu2 }
 0x373   :  { %v1250_v22 = vsel %vm1246_vm12, %v1076_v19, -inf  ;;  %v1136_v25 = vadd.f32 %v1135_v23, %v1116_v24 }
 0x374   :  { %1251 = vmax.xlane.f32.xlu0 %v1250_v22 }
 0x378   :  { %v1155_v26 = vpop.f32.mrf.mxu3 }
 0x379   :  { %v1156_v27 = vadd.f32 %v1155_v26, %v1136_v25 }
 0x37b   :  { %vm1158_vm13 = vcmp.gt.f32.partialorder %v1156_v27, 0.0  ;;  %v1159_v28 = vmul.f32 0.1, %v1156_v27 }
 0x37d   :  { %v1160_v29 = vsel %vm1158_vm13, %v1156_v27, %v1159_v28 }
 0x37e   :  { %1197 = vmatmul.f32.vlgmr.msra.gmra.mxu0 %v1160_v29 }
 0x3e7   :  { %v1252_v43 = vpop.xlane.xlu0 %1251 }
 0x3e8   :  { %v1253_v44 = vsub.f32 %v1076_v19, %v1252_v43 }
 0x3ea   :  { %v1254_v45 = vmul.f32 1.442695, %v1253_v44 }
 0x3ec   :  { %1318 = vpow2.f32 %v1254_v45 }
 0x3f2   :  { %v1319_v46 = vpop.eup %1318 }
 0x3f3   :  { %v1256_v47 = vsel %vm1246_vm12, %v1319_v46, 0.0 }
 0x3f4   :  { %1257 = vadd.xlane.f32.xlu0 %v1256_v47 }
 0x3fb   :  { %v1198_v49 = vpop.f32.mrf.mxu0 }
 0x3fc   :  { %v1199_v50 = vadd.f32 %v1316_v48, %v1198_v49 }
 0x3fe   :  { %vm1201_vm14 = vcmp.gt.f32.partialorder %v1199_v50, 0.0  ;;  %v1202_v51 = vmul.f32 0.1, %v1199_v50 }
 0x400   :  { %v1203_v52 = vsel %vm1201_vm14, %v1199_v50, %v1202_v51 }
 0x401   :  { %1240 = vmatmul.f32.vlgmr.msra.gmra.mxu1 %v1203_v52 }
 0x467   :  { %v1258_v53 = vpop.xlane.xlu0 %1257 }
 0x468   :  { %1320 = vlog2.f32 %v1258_v53 }
 0x46e   :  { %v1321_v54 = vpop.eup %1320 }
 0x46f   :  { %v1260_v55 = vmul.f32 0.6931472, %v1321_v54 }
 0x471   :  { %v1261_v56 = vadd.f32 %v1260_v55, %v1252_v43 }
 0x473   :  { %v1262_v57 = vsub.f32 %v1076_v19, %v1261_v56 }
 0x475   :  { %v1263_v58 = vsel %vm1246_vm12, %v1262_v57, %v1076_v19 }
 0x476   :  { %v1294_v60 = vclamps-f32 %v1263_v58, 5.0 }
 0x478   :  { %v1266_v63 = vsel %vm1249_vm1, %v1294_v60, %v1263_v58 }
 0x47e   :  { %v1241_v61 = vpop.f32.mrf.mxu1 }
 0x47f   :  { %v1242_v62 = vadd.f32 %v1317_v59, %v1241_v61 }
 0x481   :  { %v1267_v0 = vadd.f32 %v1266_v63, %v1242_v62 }
 0x483   :  { %1268 = vst [vmem:[#allocation22] sm:$0xff] %v1267_v0 }
 0x484   :  { %1279 = dma.vmem_to_hbm [thread:$0]  %s1275_s8, 128, %s1277_s4, [#allocation4]  }
 0x485   :  { %1648 = dma.done.wait [#allocation4], 128  }
 0x486   :  { %1649 = vsyncadd [#allocation4], 4294967168 }
 0x487   :  { %1284 = vsyncpa [#allocation3], 1 }
 0x488   :  { %1285 = vsyncpa [#allocation6], 1 }
 0x489   :  { %1286 = vsyncpa [#allocation9], 1 }
 0x48a   :  { %1287 = vsyncpa [#allocation12], 1 }
 0x48b   :  { %1288 = vsyncpa [#allocation15], 1 }
 0x48c   :  { %1289 = vsyncpa [#allocation18], 1 }
 0x48d   :  { %1290 = vsyncpa [#allocation21], 1 }
 0x48e   :  { %1291 = vsyncpa [#allocation4], 1 }

</bundles_post_ra>
